<compile_context>
chip_gen: v7x
topology: tpu7x:2x2x1
jax: 0.10.0
libtpu: 0.0.40
codegen_flags: <defaults>
</compile_context>

<pallas_src>
import functools
import math

import numpy as np

import jax
import jax.numpy as jnp
from jax.experimental import pallas as pl
from jax.experimental.pallas import tpu as pltpu

REG_MAX = 16  # Detect.reg_max

_COMPILER_PARAMS = pltpu.CompilerParams(
    dimension_semantics=("parallel",),
    vmem_limit_bytes=32 * 1024 * 1024,
)


# ----------------------------------------------------------------------------
# padded-flat layout helpers
# ----------------------------------------------------------------------------
def _flat_dims(H, W):
    """Constants for the padded-flat layout of an HxW map with a 1-px halo."""
    Wp = W + 2
    Np = (H + 2) * Wp            # rows of the flattened padded map
    L = H * Wp - 2               # contiguous span covering every interior pixel
    q0 = Wp + 1                  # flat index of pixel (0, 0)
    return Wp, Np, L, q0


def _interior_mask(H, W):
    """(L, 1) f32 mask: 1 at real pixels, 0 at horizontal padding columns."""
    Wp, _, L, q0 = _flat_dims(H, W)
    col = (np.arange(L) + q0) % Wp
    return jnp.asarray(((col >= 1) & (col <= W)).astype(np.float32)[:, None])


# ----------------------------------------------------------------------------
# in-kernel helpers
# ----------------------------------------------------------------------------
def _conv3x3(load_slab, w_ref, L, Wp, Cout):
    """3x3 conv as 9 contiguous (L, Cin) x (Cin, Cout) MXU matmuls (f32 acc)."""
    acc = jnp.zeros((L, Cout), jnp.float32)
    for ky in range(3):
        for kx in range(3):
            d = (ky - 1) * Wp + (kx - 1)
            acc = acc + jnp.dot(load_slab(d), w_ref[ky * 3 + kx],
                                preferred_element_type=jnp.float32)
    return acc


def _dwconv3x3(load_slab, w, L, Wp):
    """Depthwise 3x3 conv: 9 broadcast multiply-accumulates (VPU)."""
    acc = None
    for ky in range(3):
        for kx in range(3):
            d = (ky - 1) * Wp + (kx - 1)
            tap = w[ky * 3 + kx:ky * 3 + kx + 1, :]                # (1, C)
            t = load_slab(d).astype(jnp.float32) * tap
            acc = t if acc is None else acc + t
    return acc


def _bn_silu(y, scale_ref, shift_ref):
    """Folded BatchNorm + SiLU (single hoisted broadcast per stage)."""
    y = y * scale_ref[...] + shift_ref[...]
    return y * jax.nn.sigmoid(y)


# ----------------------------------------------------------------------------
# Pallas kernels
# ----------------------------------------------------------------------------
def _std_branch_kernel(x_ref, mask_ref, w1_ref, s1_ref, t1_ref,
                       w2_ref, s2_ref, t2_ref, wf_ref, bf_ref,
                       o_ref, act_ref, *, H, W):
    # x_ref   : (1, Np, Cin) bf16  zero-padded, flattened NHWC input (1 image)
    # mask_ref: (L, 1)  f32        1 at real pixels, 0 at horizontal pad cols
    # w1_ref  : (9, Cin, C) bf16   first 3x3 conv (tap-major)
    # w2_ref  : (9, C, C)   bf16   second 3x3 conv
    # s*/t*   : (1, C) f32         folded BatchNorm scale / shift
    # wf_ref  : (Co, C) bf16, bf_ref: (Co, 1) f32  final 1x1 conv + bias
    # o_ref   : (1, Co, Np) f32    channel-first output, spatial on lanes
    # act_ref : (Np, C) bf16       VMEM scratch reused by both conv stages
    Wp, Np, L, q0 = _flat_dims(H, W)
    C = w1_ref.shape[2]

    act_ref[...] = jnp.zeros_like(act_ref)          # halo rows / cols stay zero

    # --- stage 1: Conv3x3(Cin -> C) + BN + SiLU -----------------------------
    y = _conv3x3(lambda d: x_ref[0, q0 + d:q0 + d + L, :], w1_ref, L, Wp, C)
    y = _bn_silu(y, s1_ref, t1_ref)
    # re-zero horizontal-pad positions so stage 2 sees proper conv padding
    act_ref[q0:q0 + L, :] = (y * mask_ref[...]).astype(act_ref.dtype)

    # --- stage 2: Conv3x3(C -> C) + BN + SiLU -------------------------------
    y = _conv3x3(lambda d: act_ref[q0 + d:q0 + d + L, :], w2_ref, L, Wp, C)
    y = _bn_silu(y, s2_ref, t2_ref)
    act_ref[q0:q0 + L, :] = y.astype(act_ref.dtype)  # only a 1x1 reads this

    # --- stage 3: Conv1x1(C -> Co) + bias, channel-first lane-dense output --
    out = jax.lax.dot_general(wf_ref[...], act_ref[...],
                              (((1,), (1,)), ((), ())),
                              preferred_element_type=jnp.float32)
    o_ref[0] = (out + bf_ref[...]).astype(o_ref.dtype)


def _dw_branch_kernel(x_ref, mask_ref,
                      dw1_ref, s1_ref, t1_ref, pw1_ref, s2_ref, t2_ref,
                      dw2_ref, s3_ref, t3_ref, pw2_ref, s4_ref, t4_ref,
                      wf_ref, bf_ref, o_ref, act_ref, *, H, W):
    # cv3 class branch (Detect.legacy == False):
    #   [DWConv3x3 + BN + SiLU, Conv1x1 + BN + SiLU] x 2  ->  Conv1x1 + bias
    Wp, Np, L, q0 = _flat_dims(H, W)

    act_ref[...] = jnp.zeros_like(act_ref)

    # --- block 1: DWConv3x3(Cin) -> Conv1x1(Cin -> C) -----------------------
    y = _dwconv3x3(lambda d: x_ref[0, q0 + d:q0 + d + L, :], dw1_ref[...], L, Wp)
    y = _bn_silu(y, s1_ref, t1_ref)
    y = jnp.dot(y.astype(jnp.bfloat16), pw1_ref[...],
                preferred_element_type=jnp.float32)
    y = _bn_silu(y, s2_ref, t2_ref)
    act_ref[q0:q0 + L, :] = (y * mask_ref[...]).astype(act_ref.dtype)

    # --- block 2: DWConv3x3(C) -> Conv1x1(C -> C) ----------------------------
    y = _dwconv3x3(lambda d: act_ref[q0 + d:q0 + d + L, :], dw2_ref[...], L, Wp)
    y = _bn_silu(y, s3_ref, t3_ref)
    y = jnp.dot(y.astype(jnp.bfloat16), pw2_ref[...],
                preferred_element_type=jnp.float32)
    y = _bn_silu(y, s4_ref, t4_ref)
    act_ref[q0:q0 + L, :] = y.astype(act_ref.dtype)

    # --- final Conv1x1(C -> nc) + bias ---------------------------------------
    out = jax.lax.dot_general(wf_ref[...], act_ref[...],
                              (((1,), (1,)), ((), ())),
                              preferred_element_type=jnp.float32)
    o_ref[0] = (out + bf_ref[...]).astype(o_ref.dtype)


def _decode_kernel(box_ref, cls_ref, kpt_ref, anc_ref, str_ref,
                   isx_ref, isv_ref, o_ref):
    # box_ref: (1, 4*REG_MAX, A); cls_ref: (1, nc, A); kpt_ref: (1, nk, A)
    # anc_ref: (2, A); str_ref: (1, A)
    # isx/isv: (nk, 1) f32, 1.0 where a keypoint row is an x-coord / visibility
    # o_ref  : (1, 4 + nc + nk, A)
    nc = cls_ref.shape[1]

    ax = anc_ref[0:1, :]
    ay = anc_ref[1:2, :]
    st = str_ref[...]

    # --- DFL: softmax expectation over the 16 bins of each box side ---------
    box = box_ref[0].astype(jnp.float32)
    proj = jax.lax.broadcasted_iota(jnp.float32, (REG_MAX, 1), 0)
    sides = []
    for s in range(4):
        chunk = box[s * REG_MAX:(s + 1) * REG_MAX, :]
        chunk = chunk - jnp.max(chunk, axis=0, keepdims=True)
        e = jnp.exp(chunk)
        p = e * pl.reciprocal(jnp.sum(e, axis=0, keepdims=True), approx=True)
        sides.append(jnp.sum(p * proj, axis=0, keepdims=True))     # (1, A)
    lt_x, lt_y, rb_x, rb_y = sides

    # --- dist2bbox (xywh) * stride, direct row stores (no concatenate) -------
    x1, y1 = ax - lt_x, ay - lt_y
    x2, y2 = ax + rb_x, ay + rb_y
    o_ref[0, 0:1, :] = (x1 + x2) * 0.5 * st
    o_ref[0, 1:2, :] = (y1 + y2) * 0.5 * st
    o_ref[0, 2:3, :] = (x2 - x1) * st
    o_ref[0, 3:4, :] = (y2 - y1) * st
    o_ref[0, 4:4 + nc, :] = jax.nn.sigmoid(cls_ref[0].astype(jnp.float32))

    # --- Pose.kpts_decode (ndim == 3): rows cycle (x, y, visibility) ---------
    k = kpt_ref[0].astype(jnp.float32)
    isx = isx_ref[...]
    isv = isv_ref[...]
    anc_xy = isx * ax + (1.0 - isx) * ay                           # (nk, A)
    dec = (k * 2.0 + (anc_xy - 0.5)) * st
    o_ref[0, 4 + nc:, :] = isv * jax.nn.sigmoid(k) + (1.0 - isv) * dec


# ----------------------------------------------------------------------------
# pallas_call wrappers
# ----------------------------------------------------------------------------
def fused_std_branch(x_nhwc, w1, s1, t1, w2, s2, t2, wf, bf):
    """Conv(cin,C,3) -> Conv(C,C,3) -> Conv2d(C,Co,1)+bias, fused.

    Returns the channel-first map (B, Co, H, W)."""
    B, H, W, Cin = x_nhwc.shape
    C = w1.shape[2]
    Co = wf.shape[0]
    _, Np, L, _ = _flat_dims(H, W)

    xp = jnp.pad(x_nhwc, ((0, 0), (1, 1), (1, 1), (0, 0)))
    xp = xp.reshape(B, Np, Cin).astype(jnp.bfloat16)
    mask = _interior_mask(H, W)

    out = pl.pallas_call(
        functools.partial(_std_branch_kernel, H=H, W=W),
        out_shape=jax.ShapeDtypeStruct((B, Co, Np), jnp.float32),
        grid=(B,),
        in_specs=[
            pl.BlockSpec((1, Np, Cin), lambda b: (b, 0, 0)),
            pl.BlockSpec((L, 1), lambda b: (0, 0)),
            pl.BlockSpec((9, Cin, C), lambda b: (0, 0, 0)),
            pl.BlockSpec((1, C), lambda b: (0, 0)),
            pl.BlockSpec((1, C), lambda b: (0, 0)),
            pl.BlockSpec((9, C, C), lambda b: (0, 0, 0)),
            pl.BlockSpec((1, C), lambda b: (0, 0)),
            pl.BlockSpec((1, C), lambda b: (0, 0)),
            pl.BlockSpec((Co, C), lambda b: (0, 0)),
            pl.BlockSpec((Co, 1), lambda b: (0, 0)),
        ],
        out_specs=pl.BlockSpec((1, Co, Np), lambda b: (b, 0, 0)),
        scratch_shapes=[pltpu.VMEM((Np, C), jnp.bfloat16)],
        compiler_params=_COMPILER_PARAMS,
    )(xp, mask, w1, s1, t1, w2, s2, t2, wf, bf)
    # strip the conv halo: (B, Co, Np) -> (B, Co, H, W)
    return out.reshape(B, Co, H + 2, W + 2)[:, :, 1:H + 1, 1:W + 1]


def fused_dw_branch(x_nhwc, dw1, s1, t1, pw1, s2, t2,
                    dw2, s3, t3, pw2, s4, t4, wf, bf):
    """[DWConv(c,c,3), Conv(c,C,1)] x 2 -> Conv2d(C,Co,1)+bias, fused."""
    B, H, W, Cin = x_nhwc.shape
    C = pw1.shape[1]
    Co = wf.shape[0]
    _, Np, L, _ = _flat_dims(H, W)

    xp = jnp.pad(x_nhwc, ((0, 0), (1, 1), (1, 1), (0, 0)))
    xp = xp.reshape(B, Np, Cin).astype(jnp.bfloat16)
    mask = _interior_mask(H, W)

    out = pl.pallas_call(
        functools.partial(_dw_branch_kernel, H=H, W=W),
        out_shape=jax.ShapeDtypeStruct((B, Co, Np), jnp.float32),
        grid=(B,),
        in_specs=[
            pl.BlockSpec((1, Np, Cin), lambda b: (b, 0, 0)),
            pl.BlockSpec((L, 1), lambda b: (0, 0)),
            pl.BlockSpec((9, Cin), lambda b: (0, 0)),
            pl.BlockSpec((1, Cin), lambda b: (0, 0)),
            pl.BlockSpec((1, Cin), lambda b: (0, 0)),
            pl.BlockSpec((Cin, C), lambda b: (0, 0)),
            pl.BlockSpec((1, C), lambda b: (0, 0)),
            pl.BlockSpec((1, C), lambda b: (0, 0)),
            pl.BlockSpec((9, C), lambda b: (0, 0)),
            pl.BlockSpec((1, C), lambda b: (0, 0)),
            pl.BlockSpec((1, C), lambda b: (0, 0)),
            pl.BlockSpec((C, C), lambda b: (0, 0)),
            pl.BlockSpec((1, C), lambda b: (0, 0)),
            pl.BlockSpec((1, C), lambda b: (0, 0)),
            pl.BlockSpec((Co, C), lambda b: (0, 0)),
            pl.BlockSpec((Co, 1), lambda b: (0, 0)),
        ],
        out_specs=pl.BlockSpec((1, Co, Np), lambda b: (b, 0, 0)),
        scratch_shapes=[pltpu.VMEM((Np, C), jnp.bfloat16)],
        compiler_params=_COMPILER_PARAMS,
    )(xp, mask, dw1, s1, t1, pw1, s2, t2, dw2, s3, t3, pw2, s4, t4, wf, bf)
    return out.reshape(B, Co, H + 2, W + 2)[:, :, 1:H + 1, 1:W + 1]


def decode_detect_pose(box_cat, cls_cat, kpt_cat, anchors, strides):
    """DFL + dist2bbox*stride + sigmoid(cls) + kpts_decode, fused."""
    B, _, A = box_cat.shape
    nc = cls_cat.shape[1]
    nk = kpt_cat.shape[1]
    no_out = 4 + nc + nk

    rows = np.arange(nk) % 3
    isx = jnp.asarray((rows == 0).astype(np.float32)[:, None])
    isv = jnp.asarray((rows == 2).astype(np.float32)[:, None])

    return pl.pallas_call(
        _decode_kernel,
        out_shape=jax.ShapeDtypeStruct((B, no_out, A), jnp.float32),
        grid=(B,),
        in_specs=[
            pl.BlockSpec((1, 4 * REG_MAX, A), lambda b: (b, 0, 0)),
            pl.BlockSpec((1, nc, A), lambda b: (b, 0, 0)),
            pl.BlockSpec((1, nk, A), lambda b: (b, 0, 0)),
            pl.BlockSpec((2, A), lambda b: (0, 0)),
            pl.BlockSpec((1, A), lambda b: (0, 0)),
            pl.BlockSpec((nk, 1), lambda b: (0, 0)),
            pl.BlockSpec((nk, 1), lambda b: (0, 0)),
        ],
        out_specs=pl.BlockSpec((1, no_out, A), lambda b: (b, 0, 0)),
        compiler_params=_COMPILER_PARAMS,
    )(box_cat, cls_cat, kpt_cat, anchors, strides, isx, isv)


# ----------------------------------------------------------------------------
# JAX glue: anchors, params, full forward
# ----------------------------------------------------------------------------
def make_anchors(hw_list, strides_per_level, offset=0.5):
    """Matches ultralytics make_anchors, already transposed to (2, A) / (1, A)."""
    pts, sts = [], []
    for (h, w), s in zip(hw_list, strides_per_level):
        sx = jnp.arange(w, dtype=jnp.float32) + offset
        sy = jnp.arange(h, dtype=jnp.float32) + offset
        gy, gx = jnp.meshgrid(sy, sx, indexing="ij")
        pts.append(jnp.stack([gx, gy], axis=-1).reshape(-1, 2))
        sts.append(jnp.full((h * w, 1), s, jnp.float32))
    return jnp.concatenate(pts, 0).T, jnp.concatenate(sts, 0).T


def _fold_bn(key, cout):
    kg, kb, km, kv = jax.random.split(key, 4)
    gamma = 1.0 + 0.1 * jax.random.normal(kg, (cout,), jnp.float32)
    beta = 0.1 * jax.random.normal(kb, (cout,), jnp.float32)
    mean = 0.1 * jax.random.normal(km, (cout,), jnp.float32)
    var = 1.0 + 0.1 * jax.nn.softplus(jax.random.normal(kv, (cout,), jnp.float32))
    scale = gamma * jax.lax.rsqrt(var + 1e-3)   # BatchNorm2d eps=1e-3 (ultralytics Conv)
    shift = beta - mean * scale
    return scale.reshape(1, cout), shift.reshape(1, cout)


def _init_conv3x3(key, cin, cout):
    kw, kb = jax.random.split(key)
    w = jax.random.normal(kw, (9, cin, cout), jnp.float32) * (2.0 / (9 * cin)) ** 0.5
    s, t = _fold_bn(kb, cout)
    return w.astype(jnp.bfloat16), s, t


def _init_dw3x3(key, c):
    kw, kb = jax.random.split(key)
    w = jax.random.normal(kw, (9, c), jnp.float32) * (2.0 / 9.0) ** 0.5
    s, t = _fold_bn(kb, c)
    return w, s, t


def _init_conv1x1_bn(key, cin, cout):
    kw, kb = jax.random.split(key)
    w = jax.random.normal(kw, (cin, cout), jnp.float32) * (2.0 / cin) ** 0.5
    s, t = _fold_bn(kb, cout)
    return w.astype(jnp.bfloat16), s, t


def _init_head1x1(key, cin, cout, bias_val=None):
    """Final nn.Conv2d(cin, cout, 1) with bias; weight stored transposed (Co, C)."""
    kw, kb = jax.random.split(key)
    w = jax.random.normal(kw, (cout, cin), jnp.float32) * (2.0 / cin) ** 0.5
    if bias_val is None:
        b = 0.02 * jax.random.normal(kb, (cout, 1), jnp.float32)
    else:
        b = jnp.full((cout, 1), bias_val, jnp.float32)
    return w.astype(jnp.bfloat16), b


def init_params(key, nc, kpt_shape, ch, strides_per_level):
    nk = kpt_shape[0] * kpt_shape[1]
    c2 = max(16, ch[0] // 4, REG_MAX * 4)
    c3 = max(ch[0], min(nc, 100))
    c4 = max(ch[0] // 4, nk)
    params = []
    for i, cin in enumerate(ch):
        k = jax.random.fold_in(key, i)
        ks = jax.random.split(k, 11)
        # cv2[i]: Conv(cin,c2,3), Conv(c2,c2,3), Conv2d(c2, 4*reg_max, 1); bias_init -> 1.0
        cv2 = (*_init_conv3x3(ks[0], cin, c2), *_init_conv3x3(ks[1], c2, c2),
               *_init_head1x1(ks[2], c2, 4 * REG_MAX, bias_val=1.0))
        # cv3[i] (legacy=False): [DWConv(cin,cin,3), Conv(cin,c3,1)],
        #                        [DWConv(c3,c3,3), Conv(c3,c3,1)], Conv2d(c3,nc,1)
        cls_bias = math.log(5.0 / nc / (640.0 / strides_per_level[i]) ** 2)
        cv3 = (*_init_dw3x3(ks[3], cin), *_init_conv1x1_bn(ks[4], cin, c3),
               *_init_dw3x3(ks[5], c3), *_init_conv1x1_bn(ks[6], c3, c3),
               *_init_head1x1(ks[7], c3, nc, bias_val=cls_bias))
        # cv4[i] (Pose): Conv(cin,c4,3), Conv(c4,c4,3), Conv2d(c4, nk, 1)
        cv4 = (*_init_conv3x3(ks[8], cin, c4), *_init_conv3x3(ks[9], c4, c4),
               *_init_head1x1(ks[10], c4, nk))
        params.append(dict(cv2=cv2, cv3=cv3, cv4=cv4))
    return params


def pose_forward(x_list, params, strides_per_level, nc, kpt_shape):
    """Inference path of Pose.forward (training=False, export=False).

    Returns (y, (x_levels, kpt_raw)) mirroring PyTorch's
        (torch.cat([x[0], pred_kpt], 1), (x[1], kpt)).
    """
    assert kpt_shape[1] == 3  # TODO(synk): ndim == 2 keypoints not implemented
    nk = kpt_shape[0] * kpt_shape[1]
    B = x_list[0].shape[0]

    level_nchw, box_flat, cls_flat, kpt_flat = [], [], [], []
    for xi, p in zip(x_list, params):
        H, W = xi.shape[1], xi.shape[2]
        box = fused_std_branch(xi, *p["cv2"])    # (B, 4*REG_MAX, H, W)
        cls = fused_dw_branch(xi, *p["cv3"])     # (B, nc, H, W)
        kpt = fused_std_branch(xi, *p["cv4"])    # (B, nk, H, W)

        level_nchw.append(jnp.concatenate([box, cls], axis=1))   # (B, no, H, W)
        box_flat.append(box.reshape(B, 4 * REG_MAX, H * W))
        cls_flat.append(cls.reshape(B, nc, H * W))
        kpt_flat.append(kpt.reshape(B, nk, H * W))

    box_cat = jnp.concatenate(box_flat, axis=2)     # (B, 64, A)
    cls_cat = jnp.concatenate(cls_flat, axis=2)     # (B, nc, A)
    kpt_cat = jnp.concatenate(kpt_flat, axis=2)     # raw `kpt` aux output

    hw_list = [(xi.shape[1], xi.shape[2]) for xi in x_list]
    anchors, strides = make_anchors(hw_list, strides_per_level)

    y = decode_detect_pose(box_cat, cls_cat, kpt_cat, anchors, strides)
    return y, (level_nchw, kpt_cat)


# ----------------------------------------------------------------------------
if __name__ == "__main__":
    key = jax.random.PRNGKey(0)
    B = 2
    nc = 8
    kpt_shape = (17, 3)          # Pose default -> nk = 51
    ch = (32, 64)                # per-level input channels
    hw = [(8, 8), (4, 4)]
    # NOTE: Detect.stride defaults to zeros and is filled in after model build;
    # use typical YOLO strides so the decoded boxes/keypoints are non-trivial.
    strides_per_level = (8.0, 16.0)

    k_in, k_par = jax.random.split(key)
    x_list = [
        jax.random.normal(jax.random.fold_in(k_in, i), (B, h, w, c), jnp.float32)
        for i, ((h, w), c) in enumerate(zip(hw, ch))
    ]
    params = init_params(k_par, nc, kpt_shape, ch, strides_per_level)

    y, (x_levels, kpt_raw) = pose_forward(x_list, params, strides_per_level,
                                          nc, kpt_shape)
    y = jax.block_until_ready(y)
    for t in x_levels:
        jax.block_until_ready(t)
    jax.block_until_ready(kpt_raw)

    nk = kpt_shape[0] * kpt_shape[1]
    A = sum(h * w for h, w in hw)
    no = nc + 4 * REG_MAX
    assert y.shape == (B, 4 + nc + nk, A), y.shape
    assert x_levels[0].shape == (B, no, hw[0][0], hw[0][1]), x_levels[0].shape
    assert x_levels[1].shape == (B, no, hw[1][0], hw[1][1]), x_levels[1].shape
    assert kpt_raw.shape == (B, nk, A), kpt_raw.shape
    assert bool(jnp.all(jnp.isfinite(y)))
    print("KERNEL_OK")
</pallas_src>

<mosaic_0001>
module attributes {stable_mosaic.version = 11 : i64} {
  func.func @_std_branch_kernel(%arg0: i32, %arg1: memref<1x100x32xbf16, #tpu.memory_space<vmem>>, %arg2: memref<78x1xf32, #tpu.memory_space<vmem>>, %arg3: memref<9x32x64xbf16, #tpu.memory_space<vmem>>, %arg4: memref<1x64xf32, #tpu.memory_space<vmem>>, %arg5: memref<1x64xf32, #tpu.memory_space<vmem>>, %arg6: memref<9x64x64xbf16, #tpu.memory_space<vmem>>, %arg7: memref<1x64xf32, #tpu.memory_space<vmem>>, %arg8: memref<1x64xf32, #tpu.memory_space<vmem>>, %arg9: memref<64x64xbf16, #tpu.memory_space<vmem>>, %arg10: memref<64x1xf32, #tpu.memory_space<vmem>>, %arg11: memref<1x64x100xf32, #tpu.memory_space<vmem>>, %arg12: memref<100x64xbf16, #tpu.memory_space<vmem>>) attributes {dimension_semantics = [#tpu.dimension_semantics<parallel>], iteration_bounds = array<i64: 2>, scalar_prefetch = 0 : i64, scratch_operands = 1 : i64, tpu.core_type = #tpu.core_type<tc>, window_params = [{transform_indices = @transform_0, window_bounds = array<i64: 1, 100, 32>}, {pipeline_mode = #tpu.pipeline_mode<synchronous>, transform_indices = @transform_1, window_bounds = array<i64: 78, 1>}, {pipeline_mode = #tpu.pipeline_mode<synchronous>, transform_indices = @transform_2, window_bounds = array<i64: 9, 32, 64>}, {pipeline_mode = #tpu.pipeline_mode<synchronous>, transform_indices = @transform_3, window_bounds = array<i64: 1, 64>}, {pipeline_mode = #tpu.pipeline_mode<synchronous>, transform_indices = @transform_4, window_bounds = array<i64: 1, 64>}, {pipeline_mode = #tpu.pipeline_mode<synchronous>, transform_indices = @transform_5, window_bounds = array<i64: 9, 64, 64>}, {pipeline_mode = #tpu.pipeline_mode<synchronous>, transform_indices = @transform_6, window_bounds = array<i64: 1, 64>}, {pipeline_mode = #tpu.pipeline_mode<synchronous>, transform_indices = @transform_7, window_bounds = array<i64: 1, 64>}, {pipeline_mode = #tpu.pipeline_mode<synchronous>, transform_indices = @transform_8, window_bounds = array<i64: 64, 64>}, {pipeline_mode = #tpu.pipeline_mode<synchronous>, transform_indices = @transform_9, window_bounds = array<i64: 64, 1>}, {transform_indices = @transform_10, window_bounds = array<i64: 1, 64, 100>}]} {
    %cst = arith.constant 0.000000e+00 : bf16
    %0 = vector.broadcast %cst : bf16 to vector<100x64xbf16>
    %c0 = arith.constant 0 : index
    %c0_0 = arith.constant 0 : index
    %1 = vector.load %arg12[%c0, %c0_0] : memref<100x64xbf16, #tpu.memory_space<vmem>>, vector<100x64xbf16>
    tpu.vector_store %arg12[%c0, %c0_0], %0 {strides = array<i32>} : memref<100x64xbf16, #tpu.memory_space<vmem>>, vector<100x64xbf16>,
    %cst_1 = arith.constant 0.000000e+00 : f32
    %2 = vector.broadcast %cst_1 : f32 to vector<78x64xf32>
    %c0_2 = arith.constant 0 : index
    %c0_3 = arith.constant 0 : index
    %c0_4 = arith.constant 0 : index
    %3 = vector.load %arg1[%c0_2, %c0_3, %c0_4] : memref<1x100x32xbf16, #tpu.memory_space<vmem>>, vector<1x78x32xbf16>
    %4 = vector.shape_cast %3 : vector<1x78x32xbf16> to vector<78x32xbf16>
    %c0_5 = arith.constant 0 : index
    %c0_6 = arith.constant 0 : index
    %c0_7 = arith.constant 0 : index
    %5 = vector.load %arg3[%c0_5, %c0_6, %c0_7] : memref<9x32x64xbf16, #tpu.memory_space<vmem>>, vector<1x32x64xbf16>
    %6 = vector.shape_cast %5 : vector<1x32x64xbf16> to vector<32x64xbf16>
    %cst_8 = arith.constant dense<0.000000e+00> : vector<78x64xf32>
    %7 = tpu.matmul %4, %6, %cst_8 {dimension_numbers = #tpu.dot_dimension_numbers<[1], [0], [0], [1], [0, 0, 1, 1], [], []>} : vector<78x32xbf16>, vector<32x64xbf16>, vector<78x64xf32> -> vector<78x64xf32>
    %8 = arith.addf %2, %7 : vector<78x64xf32>
    %c0_9 = arith.constant 0 : index
    %c1 = arith.constant 1 : index
    %c0_10 = arith.constant 0 : index
    %9 = vector.load %arg1[%c0_9, %c1, %c0_10] : memref<1x100x32xbf16, #tpu.memory_space<vmem>>, vector<1x78x32xbf16>
    %10 = vector.shape_cast %9 : vector<1x78x32xbf16> to vector<78x32xbf16>
    %c1_11 = arith.constant 1 : index
    %c0_12 = arith.constant 0 : index
    %c0_13 = arith.constant 0 : index
    %11 = vector.load %arg3[%c1_11, %c0_12, %c0_13] : memref<9x32x64xbf16, #tpu.memory_space<vmem>>, vector<1x32x64xbf16>
    %12 = vector.shape_cast %11 : vector<1x32x64xbf16> to vector<32x64xbf16>
    %cst_14 = arith.constant dense<0.000000e+00> : vector<78x64xf32>
    %13 = tpu.matmul %10, %12, %cst_14 {dimension_numbers = #tpu.dot_dimension_numbers<[1], [0], [0], [1], [0, 0, 1, 1], [], []>} : vector<78x32xbf16>, vector<32x64xbf16>, vector<78x64xf32> -> vector<78x64xf32>
    %14 = arith.addf %8, %13 : vector<78x64xf32>
    %c0_15 = arith.constant 0 : index
    %c2 = arith.constant 2 : index
    %c0_16 = arith.constant 0 : index
    %15 = vector.load %arg1[%c0_15, %c2, %c0_16] : memref<1x100x32xbf16, #tpu.memory_space<vmem>>, vector<1x78x32xbf16>
    %16 = vector.shape_cast %15 : vector<1x78x32xbf16> to vector<78x32xbf16>
    %c2_17 = arith.constant 2 : index
    %c0_18 = arith.constant 0 : index
    %c0_19 = arith.constant 0 : index
    %17 = vector.load %arg3[%c2_17, %c0_18, %c0_19] : memref<9x32x64xbf16, #tpu.memory_space<vmem>>, vector<1x32x64xbf16>
    %18 = vector.shape_cast %17 : vector<1x32x64xbf16> to vector<32x64xbf16>
    %cst_20 = arith.constant dense<0.000000e+00> : vector<78x64xf32>
    %19 = tpu.matmul %16, %18, %cst_20 {dimension_numbers = #tpu.dot_dimension_numbers<[1], [0], [0], [1], [0, 0, 1, 1], [], []>} : vector<78x32xbf16>, vector<32x64xbf16>, vector<78x64xf32> -> vector<78x64xf32>
    %20 = arith.addf %14, %19 : vector<78x64xf32>
    %c0_21 = arith.constant 0 : index
    %c10 = arith.constant 10 : index
    %c0_22 = arith.constant 0 : index
    %21 = vector.load %arg1[%c0_21, %c10, %c0_22] : memref<1x100x32xbf16, #tpu.memory_space<vmem>>, vector<1x78x32xbf16>
    %22 = vector.shape_cast %21 : vector<1x78x32xbf16> to vector<78x32xbf16>
    %c3 = arith.constant 3 : index
    %c0_23 = arith.constant 0 : index
    %c0_24 = arith.constant 0 : index
    %23 = vector.load %arg3[%c3, %c0_23, %c0_24] : memref<9x32x64xbf16, #tpu.memory_space<vmem>>, vector<1x32x64xbf16>
    %24 = vector.shape_cast %23 : vector<1x32x64xbf16> to vector<32x64xbf16>
    %cst_25 = arith.constant dense<0.000000e+00> : vector<78x64xf32>
    %25 = tpu.matmul %22, %24, %cst_25 {dimension_numbers = #tpu.dot_dimension_numbers<[1], [0], [0], [1], [0, 0, 1, 1], [], []>} : vector<78x32xbf16>, vector<32x64xbf16>, vector<78x64xf32> -> vector<78x64xf32>
    %26 = arith.addf %20, %25 : vector<78x64xf32>
    %c0_26 = arith.constant 0 : index
    %c11 = arith.constant 11 : index
    %c0_27 = arith.constant 0 : index
    %27 = vector.load %arg1[%c0_26, %c11, %c0_27] : memref<1x100x32xbf16, #tpu.memory_space<vmem>>, vector<1x78x32xbf16>
    %28 = vector.shape_cast %27 : vector<1x78x32xbf16> to vector<78x32xbf16>
    %c4 = arith.constant 4 : index
    %c0_28 = arith.constant 0 : index
    %c0_29 = arith.constant 0 : index
    %29 = vector.load %arg3[%c4, %c0_28, %c0_29] : memref<9x32x64xbf16, #tpu.memory_space<vmem>>, vector<1x32x64xbf16>
    %30 = vector.shape_cast %29 : vector<1x32x64xbf16> to vector<32x64xbf16>
    %cst_30 = arith.constant dense<0.000000e+00> : vector<78x64xf32>
    %31 = tpu.matmul %28, %30, %cst_30 {dimension_numbers = #tpu.dot_dimension_numbers<[1], [0], [0], [1], [0, 0, 1, 1], [], []>} : vector<78x32xbf16>, vector<32x64xbf16>, vector<78x64xf32> -> vector<78x64xf32>
    %32 = arith.addf %26, %31 : vector<78x64xf32>
    %c0_31 = arith.constant 0 : index
    %c12 = arith.constant 12 : index
    %c0_32 = arith.constant 0 : index
    %33 = vector.load %arg1[%c0_31, %c12, %c0_32] : memref<1x100x32xbf16, #tpu.memory_space<vmem>>, vector<1x78x32xbf16>
    %34 = vector.shape_cast %33 : vector<1x78x32xbf16> to vector<78x32xbf16>
    %c5 = arith.constant 5 : index
    %c0_33 = arith.constant 0 : index
    %c0_34 = arith.constant 0 : index
    %35 = vector.load %arg3[%c5, %c0_33, %c0_34] : memref<9x32x64xbf16, #tpu.memory_space<vmem>>, vector<1x32x64xbf16>
    %36 = vector.shape_cast %35 : vector<1x32x64xbf16> to vector<32x64xbf16>
    %cst_35 = arith.constant dense<0.000000e+00> : vector<78x64xf32>
    %37 = tpu.matmul %34, %36, %cst_35 {dimension_numbers = #tpu.dot_dimension_numbers<[1], [0], [0], [1], [0, 0, 1, 1], [], []>} : vector<78x32xbf16>, vector<32x64xbf16>, vector<78x64xf32> -> vector<78x64xf32>
    %38 = arith.addf %32, %37 : vector<78x64xf32>
    %c0_36 = arith.constant 0 : index
    %c20 = arith.constant 20 : index
    %c0_37 = arith.constant 0 : index
    %39 = vector.load %arg1[%c0_36, %c20, %c0_37] : memref<1x100x32xbf16, #tpu.memory_space<vmem>>, vector<1x78x32xbf16>
    %40 = vector.shape_cast %39 : vector<1x78x32xbf16> to vector<78x32xbf16>
    %c6 = arith.constant 6 : index
    %c0_38 = arith.constant 0 : index
    %c0_39 = arith.constant 0 : index
    %41 = vector.load %arg3[%c6, %c0_38, %c0_39] : memref<9x32x64xbf16, #tpu.memory_space<vmem>>, vector<1x32x64xbf16>
    %42 = vector.shape_cast %41 : vector<1x32x64xbf16> to vector<32x64xbf16>
    %cst_40 = arith.constant dense<0.000000e+00> : vector<78x64xf32>
    %43 = tpu.matmul %40, %42, %cst_40 {dimension_numbers = #tpu.dot_dimension_numbers<[1], [0], [0], [1], [0, 0, 1, 1], [], []>} : vector<78x32xbf16>, vector<32x64xbf16>, vector<78x64xf32> -> vector<78x64xf32>
    %44 = arith.addf %38, %43 : vector<78x64xf32>
    %c0_41 = arith.constant 0 : index
    %c21 = arith.constant 21 : index
    %c0_42 = arith.constant 0 : index
    %45 = vector.load %arg1[%c0_41, %c21, %c0_42] : memref<1x100x32xbf16, #tpu.memory_space<vmem>>, vector<1x78x32xbf16>
    %46 = vector.shape_cast %45 : vector<1x78x32xbf16> to vector<78x32xbf16>
    %c7 = arith.constant 7 : index
    %c0_43 = arith.constant 0 : index
    %c0_44 = arith.constant 0 : index
    %47 = vector.load %arg3[%c7, %c0_43, %c0_44] : memref<9x32x64xbf16, #tpu.memory_space<vmem>>, vector<1x32x64xbf16>
    %48 = vector.shape_cast %47 : vector<1x32x64xbf16> to vector<32x64xbf16>
    %cst_45 = arith.constant dense<0.000000e+00> : vector<78x64xf32>
    %49 = tpu.matmul %46, %48, %cst_45 {dimension_numbers = #tpu.dot_dimension_numbers<[1], [0], [0], [1], [0, 0, 1, 1], [], []>} : vector<78x32xbf16>, vector<32x64xbf16>, vector<78x64xf32> -> vector<78x64xf32>
    %50 = arith.addf %44, %49 : vector<78x64xf32>
    %c0_46 = arith.constant 0 : index
    %c22 = arith.constant 22 : index
    %c0_47 = arith.constant 0 : index
    %51 = vector.load %arg1[%c0_46, %c22, %c0_47] : memref<1x100x32xbf16, #tpu.memory_space<vmem>>, vector<1x78x32xbf16>
    %52 = vector.shape_cast %51 : vector<1x78x32xbf16> to vector<78x32xbf16>
    %c8 = arith.constant 8 : index
    %c0_48 = arith.constant 0 : index
    %c0_49 = arith.constant 0 : index
    %53 = vector.load %arg3[%c8, %c0_48, %c0_49] : memref<9x32x64xbf16, #tpu.memory_space<vmem>>, vector<1x32x64xbf16>
    %54 = vector.shape_cast %53 : vector<1x32x64xbf16> to vector<32x64xbf16>
    %cst_50 = arith.constant dense<0.000000e+00> : vector<78x64xf32>
    %55 = tpu.matmul %52, %54, %cst_50 {dimension_numbers = #tpu.dot_dimension_numbers<[1], [0], [0], [1], [0, 0, 1, 1], [], []>} : vector<78x32xbf16>, vector<32x64xbf16>, vector<78x64xf32> -> vector<78x64xf32>
    %56 = arith.addf %50, %55 : vector<78x64xf32>
    %c0_51 = arith.constant 0 : index
    %c0_52 = arith.constant 0 : index
    %57 = vector.load %arg4[%c0_51, %c0_52] : memref<1x64xf32, #tpu.memory_space<vmem>>, vector<1x64xf32>
    %58 = vector.broadcast %57 : vector<1x64xf32> to vector<78x64xf32>
    %59 = arith.mulf %56, %58 : vector<78x64xf32>
    %c0_53 = arith.constant 0 : index
    %c0_54 = arith.constant 0 : index
    %60 = vector.load %arg5[%c0_53, %c0_54] : memref<1x64xf32, #tpu.memory_space<vmem>>, vector<1x64xf32>
    %61 = vector.broadcast %60 : vector<1x64xf32> to vector<78x64xf32>
    %62 = arith.addf %59, %61 : vector<78x64xf32>
    %63 = arith.negf %62 : vector<78x64xf32>
    %64 = math.exp %63 : vector<78x64xf32>
    %cst_55 = arith.constant 1.000000e+00 : f32
    %65 = vector.broadcast %cst_55 : f32 to vector<78x64xf32>
    %66 = arith.addf %65, %64 : vector<78x64xf32>
    %67 = arith.divf %65, %66 : vector<78x64xf32>
    %68 = arith.mulf %62, %67 : vector<78x64xf32>
    %c0_56 = arith.constant 0 : index
    %c0_57 = arith.constant 0 : index
    %69 = vector.load %arg2[%c0_56, %c0_57] : memref<78x1xf32, #tpu.memory_space<vmem>>, vector<78x1xf32>
    %70 = vector.broadcast %69 : vector<78x1xf32> to vector<78x64xf32>
    %71 = arith.mulf %68, %70 : vector<78x64xf32>
    %72 = arith.truncf %71 : vector<78x64xf32> to vector<78x64xbf16>
    %c11_58 = arith.constant 11 : index
    %c0_59 = arith.constant 0 : index
    %73 = vector.load %arg12[%c11_58, %c0_59] : memref<100x64xbf16, #tpu.memory_space<vmem>>, vector<78x64xbf16>
    tpu.vector_store %arg12[%c11_58, %c0_59], %72 {strides = array<i32>} : memref<100x64xbf16, #tpu.memory_space<vmem>>, vector<78x64xbf16>,
    %cst_60 = arith.constant 0.000000e+00 : f32
    %74 = vector.broadcast %cst_60 : f32 to vector<78x64xf32>
    %c0_61 = arith.constant 0 : index
    %c0_62 = arith.constant 0 : index
    %75 = vector.load %arg12[%c0_61, %c0_62] : memref<100x64xbf16, #tpu.memory_space<vmem>>, vector<78x64xbf16>
    %c0_63 = arith.constant 0 : index
    %c0_64 = arith.constant 0 : index
    %c0_65 = arith.constant 0 : index
    %76 = vector.load %arg6[%c0_63, %c0_64, %c0_65] : memref<9x64x64xbf16, #tpu.memory_space<vmem>>, vector<1x64x64xbf16>
    %77 = vector.shape_cast %76 : vector<1x64x64xbf16> to vector<64x64xbf16>
    %cst_66 = arith.constant dense<0.000000e+00> : vector<78x64xf32>
    %78 = tpu.matmul %75, %77, %cst_66 {dimension_numbers = #tpu.dot_dimension_numbers<[1], [0], [0], [1], [0, 0, 1, 1], [], []>} : vector<78x64xbf16>, vector<64x64xbf16>, vector<78x64xf32> -> vector<78x64xf32>
    %79 = arith.addf %74, %78 : vector<78x64xf32>
    %c1_67 = arith.constant 1 : index
    %c0_68 = arith.constant 0 : index
    %80 = vector.load %arg12[%c1_67, %c0_68] : memref<100x64xbf16, #tpu.memory_space<vmem>>, vector<78x64xbf16>
    %c1_69 = arith.constant 1 : index
    %c0_70 = arith.constant 0 : index
    %c0_71 = arith.constant 0 : index
    %81 = vector.load %arg6[%c1_69, %c0_70, %c0_71] : memref<9x64x64xbf16, #tpu.memory_space<vmem>>, vector<1x64x64xbf16>
    %82 = vector.shape_cast %81 : vector<1x64x64xbf16> to vector<64x64xbf16>
    %cst_72 = arith.constant dense<0.000000e+00> : vector<78x64xf32>
    %83 = tpu.matmul %80, %82, %cst_72 {dimension_numbers = #tpu.dot_dimension_numbers<[1], [0], [0], [1], [0, 0, 1, 1], [], []>} : vector<78x64xbf16>, vector<64x64xbf16>, vector<78x64xf32> -> vector<78x64xf32>
    %84 = arith.addf %79, %83 : vector<78x64xf32>
    %c2_73 = arith.constant 2 : index
    %c0_74 = arith.constant 0 : index
    %85 = vector.load %arg12[%c2_73, %c0_74] : memref<100x64xbf16, #tpu.memory_space<vmem>>, vector<78x64xbf16>
    %c2_75 = arith.constant 2 : index
    %c0_76 = arith.constant 0 : index
    %c0_77 = arith.constant 0 : index
    %86 = vector.load %arg6[%c2_75, %c0_76, %c0_77] : memref<9x64x64xbf16, #tpu.memory_space<vmem>>, vector<1x64x64xbf16>
    %87 = vector.shape_cast %86 : vector<1x64x64xbf16> to vector<64x64xbf16>
    %cst_78 = arith.constant dense<0.000000e+00> : vector<78x64xf32>
    %88 = tpu.matmul %85, %87, %cst_78 {dimension_numbers = #tpu.dot_dimension_numbers<[1], [0], [0], [1], [0, 0, 1, 1], [], []>} : vector<78x64xbf16>, vector<64x64xbf16>, vector<78x64xf32> -> vector<78x64xf32>
    %89 = arith.addf %84, %88 : vector<78x64xf32>
    %c10_79 = arith.constant 10 : index
    %c0_80 = arith.constant 0 : index
    %90 = vector.load %arg12[%c10_79, %c0_80] : memref<100x64xbf16, #tpu.memory_space<vmem>>, vector<78x64xbf16>
    %c3_81 = arith.constant 3 : index
    %c0_82 = arith.constant 0 : index
    %c0_83 = arith.constant 0 : index
    %91 = vector.load %arg6[%c3_81, %c0_82, %c0_83] : memref<9x64x64xbf16, #tpu.memory_space<vmem>>, vector<1x64x64xbf16>
    %92 = vector.shape_cast %91 : vector<1x64x64xbf16> to vector<64x64xbf16>
    %cst_84 = arith.constant dense<0.000000e+00> : vector<78x64xf32>
    %93 = tpu.matmul %90, %92, %cst_84 {dimension_numbers = #tpu.dot_dimension_numbers<[1], [0], [0], [1], [0, 0, 1, 1], [], []>} : vector<78x64xbf16>, vector<64x64xbf16>, vector<78x64xf32> -> vector<78x64xf32>
    %94 = arith.addf %89, %93 : vector<78x64xf32>
    %c11_85 = arith.constant 11 : index
    %c0_86 = arith.constant 0 : index
    %95 = vector.load %arg12[%c11_85, %c0_86] : memref<100x64xbf16, #tpu.memory_space<vmem>>, vector<78x64xbf16>
    %c4_87 = arith.constant 4 : index
    %c0_88 = arith.constant 0 : index
    %c0_89 = arith.constant 0 : index
    %96 = vector.load %arg6[%c4_87, %c0_88, %c0_89] : memref<9x64x64xbf16, #tpu.memory_space<vmem>>, vector<1x64x64xbf16>
    %97 = vector.shape_cast %96 : vector<1x64x64xbf16> to vector<64x64xbf16>
    %cst_90 = arith.constant dense<0.000000e+00> : vector<78x64xf32>
    %98 = tpu.matmul %95, %97, %cst_90 {dimension_numbers = #tpu.dot_dimension_numbers<[1], [0], [0], [1], [0, 0, 1, 1], [], []>} : vector<78x64xbf16>, vector<64x64xbf16>, vector<78x64xf32> -> vector<78x64xf32>
    %99 = arith.addf %94, %98 : vector<78x64xf32>
    %c12_91 = arith.constant 12 : index
    %c0_92 = arith.constant 0 : index
    %100 = vector.load %arg12[%c12_91, %c0_92] : memref<100x64xbf16, #tpu.memory_space<vmem>>, vector<78x64xbf16>
    %c5_93 = arith.constant 5 : index
    %c0_94 = arith.constant 0 : index
    %c0_95 = arith.constant 0 : index
    %101 = vector.load %arg6[%c5_93, %c0_94, %c0_95] : memref<9x64x64xbf16, #tpu.memory_space<vmem>>, vector<1x64x64xbf16>
    %102 = vector.shape_cast %101 : vector<1x64x64xbf16> to vector<64x64xbf16>
    %cst_96 = arith.constant dense<0.000000e+00> : vector<78x64xf32>
    %103 = tpu.matmul %100, %102, %cst_96 {dimension_numbers = #tpu.dot_dimension_numbers<[1], [0], [0], [1], [0, 0, 1, 1], [], []>} : vector<78x64xbf16>, vector<64x64xbf16>, vector<78x64xf32> -> vector<78x64xf32>
    %104 = arith.addf %99, %103 : vector<78x64xf32>
    %c20_97 = arith.constant 20 : index
    %c0_98 = arith.constant 0 : index
    %105 = vector.load %arg12[%c20_97, %c0_98] : memref<100x64xbf16, #tpu.memory_space<vmem>>, vector<78x64xbf16>
    %c6_99 = arith.constant 6 : index
    %c0_100 = arith.constant 0 : index
    %c0_101 = arith.constant 0 : index
    %106 = vector.load %arg6[%c6_99, %c0_100, %c0_101] : memref<9x64x64xbf16, #tpu.memory_space<vmem>>, vector<1x64x64xbf16>
    %107 = vector.shape_cast %106 : vector<1x64x64xbf16> to vector<64x64xbf16>
    %cst_102 = arith.constant dense<0.000000e+00> : vector<78x64xf32>
    %108 = tpu.matmul %105, %107, %cst_102 {dimension_numbers = #tpu.dot_dimension_numbers<[1], [0], [0], [1], [0, 0, 1, 1], [], []>} : vector<78x64xbf16>, vector<64x64xbf16>, vector<78x64xf32> -> vector<78x64xf32>
    %109 = arith.addf %104, %108 : vector<78x64xf32>
    %c21_103 = arith.constant 21 : index
    %c0_104 = arith.constant 0 : index
    %110 = vector.load %arg12[%c21_103, %c0_104] : memref<100x64xbf16, #tpu.memory_space<vmem>>, vector<78x64xbf16>
    %c7_105 = arith.constant 7 : index
    %c0_106 = arith.constant 0 : index
    %c0_107 = arith.constant 0 : index
    %111 = vector.load %arg6[%c7_105, %c0_106, %c0_107] : memref<9x64x64xbf16, #tpu.memory_space<vmem>>, vector<1x64x64xbf16>
    %112 = vector.shape_cast %111 : vector<1x64x64xbf16> to vector<64x64xbf16>
    %cst_108 = arith.constant dense<0.000000e+00> : vector<78x64xf32>
    %113 = tpu.matmul %110, %112, %cst_108 {dimension_numbers = #tpu.dot_dimension_numbers<[1], [0], [0], [1], [0, 0, 1, 1], [], []>} : vector<78x64xbf16>, vector<64x64xbf16>, vector<78x64xf32> -> vector<78x64xf32>
    %114 = arith.addf %109, %113 : vector<78x64xf32>
    %c22_109 = arith.constant 22 : index
    %c0_110 = arith.constant 0 : index
    %115 = vector.load %arg12[%c22_109, %c0_110] : memref<100x64xbf16, #tpu.memory_space<vmem>>, vector<78x64xbf16>
    %c8_111 = arith.constant 8 : index
    %c0_112 = arith.constant 0 : index
    %c0_113 = arith.constant 0 : index
    %116 = vector.load %arg6[%c8_111, %c0_112, %c0_113] : memref<9x64x64xbf16, #tpu.memory_space<vmem>>, vector<1x64x64xbf16>
    %117 = vector.shape_cast %116 : vector<1x64x64xbf16> to vector<64x64xbf16>
    %cst_114 = arith.constant dense<0.000000e+00> : vector<78x64xf32>
    %118 = tpu.matmul %115, %117, %cst_114 {dimension_numbers = #tpu.dot_dimension_numbers<[1], [0], [0], [1], [0, 0, 1, 1], [], []>} : vector<78x64xbf16>, vector<64x64xbf16>, vector<78x64xf32> -> vector<78x64xf32>
    %119 = arith.addf %114, %118 : vector<78x64xf32>
    %c0_115 = arith.constant 0 : index
    %c0_116 = arith.constant 0 : index
    %120 = vector.load %arg7[%c0_115, %c0_116] : memref<1x64xf32, #tpu.memory_space<vmem>>, vector<1x64xf32>
    %121 = vector.broadcast %120 : vector<1x64xf32> to vector<78x64xf32>
    %122 = arith.mulf %119, %121 : vector<78x64xf32>
    %c0_117 = arith.constant 0 : index
    %c0_118 = arith.constant 0 : index
    %123 = vector.load %arg8[%c0_117, %c0_118] : memref<1x64xf32, #tpu.memory_space<vmem>>, vector<1x64xf32>
    %124 = vector.broadcast %123 : vector<1x64xf32> to vector<78x64xf32>
    %125 = arith.addf %122, %124 : vector<78x64xf32>
    %126 = arith.negf %125 : vector<78x64xf32>
    %127 = math.exp %126 : vector<78x64xf32>
    %cst_119 = arith.constant 1.000000e+00 : f32
    %128 = vector.broadcast %cst_119 : f32 to vector<78x64xf32>
    %129 = arith.addf %128, %127 : vector<78x64xf32>
    %130 = arith.divf %128, %129 : vector<78x64xf32>
    %131 = arith.mulf %125, %130 : vector<78x64xf32>
    %132 = arith.truncf %131 : vector<78x64xf32> to vector<78x64xbf16>
    %c11_120 = arith.constant 11 : index
    %c0_121 = arith.constant 0 : index
    %133 = vector.load %arg12[%c11_120, %c0_121] : memref<100x64xbf16, #tpu.memory_space<vmem>>, vector<78x64xbf16>
    tpu.vector_store %arg12[%c11_120, %c0_121], %132 {strides = array<i32>} : memref<100x64xbf16, #tpu.memory_space<vmem>>, vector<78x64xbf16>,
    %c0_122 = arith.constant 0 : index
    %c0_123 = arith.constant 0 : index
    %134 = vector.load %arg9[%c0_122, %c0_123] : memref<64x64xbf16, #tpu.memory_space<vmem>>, vector<64x64xbf16>
    %c0_124 = arith.constant 0 : index
    %c0_125 = arith.constant 0 : index
    %135 = vector.load %arg12[%c0_124, %c0_125] : memref<100x64xbf16, #tpu.memory_space<vmem>>, vector<100x64xbf16>
    %cst_126 = arith.constant dense<0.000000e+00> : vector<64x100xf32>
    %136 = tpu.matmul %134, %135, %cst_126 {dimension_numbers = #tpu.dot_dimension_numbers<[1], [1], [0], [0], [0, 0, 1, 0], [], []>} : vector<64x64xbf16>, vector<100x64xbf16>, vector<64x100xf32> -> vector<64x100xf32>
    %c0_127 = arith.constant 0 : index
    %c0_128 = arith.constant 0 : index
    %137 = vector.load %arg10[%c0_127, %c0_128] : memref<64x1xf32, #tpu.memory_space<vmem>>, vector<64x1xf32>
    %138 = vector.broadcast %137 : vector<64x1xf32> to vector<64x100xf32>
    %139 = arith.addf %136, %138 : vector<64x100xf32>
    %c0_129 = arith.constant 0 : index
    %c0_130 = arith.constant 0 : index
    %c0_131 = arith.constant 0 : index
    %140 = vector.load %arg11[%c0_129, %c0_130, %c0_131] : memref<1x64x100xf32, #tpu.memory_space<vmem>>, vector<1x64x100xf32>
    %141 = vector.shape_cast %140 : vector<1x64x100xf32> to vector<64x100xf32>
    %142 = vector.shape_cast %139 : vector<64x100xf32> to vector<1x64x100xf32>
    tpu.vector_store %arg11[%c0_129, %c0_130, %c0_131], %142 {strides = array<i32>} : memref<1x64x100xf32, #tpu.memory_space<vmem>>, vector<1x64x100xf32>,
    return
  }
  func.func @transform_0(%arg0: i32) -> (i32, i32, i32) {
    %c0_i32 = arith.constant 0 : i32
    %c0_i32_0 = arith.constant 0 : i32
    %c0_i32_1 = arith.constant 0 : i32
    return %arg0, %c0_i32, %c0_i32_0 : i32, i32, i32
  }
  func.func @transform_1(%arg0: i32) -> (i32, i32) {
    %c0_i32 = arith.constant 0 : i32
    %c0_i32_0 = arith.constant 0 : i32
    %c0_i32_1 = arith.constant 0 : i32
    return %c0_i32, %c0_i32_0 : i32, i32
  }
  func.func @transform_2(%arg0: i32) -> (i32, i32, i32) {
    %c0_i32 = arith.constant 0 : i32
    %c0_i32_0 = arith.constant 0 : i32
    %c0_i32_1 = arith.constant 0 : i32
    %c0_i32_2 = arith.constant 0 : i32
    return %c0_i32, %c0_i32_0, %c0_i32_1 : i32, i32, i32
  }
  func.func @transform_3(%arg0: i32) -> (i32, i32) {
    %c0_i32 = arith.constant 0 : i32
    %c0_i32_0 = arith.constant 0 : i32
    %c0_i32_1 = arith.constant 0 : i32
    return %c0_i32, %c0_i32_0 : i32, i32
  }
  func.func @transform_4(%arg0: i32) -> (i32, i32) {
    %c0_i32 = arith.constant 0 : i32
    %c0_i32_0 = arith.constant 0 : i32
    %c0_i32_1 = arith.constant 0 : i32
    return %c0_i32, %c0_i32_0 : i32, i32
  }
  func.func @transform_5(%arg0: i32) -> (i32, i32, i32) {
    %c0_i32 = arith.constant 0 : i32
    %c0_i32_0 = arith.constant 0 : i32
    %c0_i32_1 = arith.constant 0 : i32
    %c0_i32_2 = arith.constant 0 : i32
    return %c0_i32, %c0_i32_0, %c0_i32_1 : i32, i32, i32
  }
  func.func @transform_6(%arg0: i32) -> (i32, i32) {
    %c0_i32 = arith.constant 0 : i32
    %c0_i32_0 = arith.constant 0 : i32
    %c0_i32_1 = arith.constant 0 : i32
    return %c0_i32, %c0_i32_0 : i32, i32
  }
  func.func @transform_7(%arg0: i32) -> (i32, i32) {
    %c0_i32 = arith.constant 0 : i32
    %c0_i32_0 = arith.constant 0 : i32
    %c0_i32_1 = arith.constant 0 : i32
    return %c0_i32, %c0_i32_0 : i32, i32
  }
  func.func @transform_8(%arg0: i32) -> (i32, i32) {
    %c0_i32 = arith.constant 0 : i32
    %c0_i32_0 = arith.constant 0 : i32
    %c0_i32_1 = arith.constant 0 : i32
    return %c0_i32, %c0_i32_0 : i32, i32
  }
  func.func @transform_9(%arg0: i32) -> (i32, i32) {
    %c0_i32 = arith.constant 0 : i32
    %c0_i32_0 = arith.constant 0 : i32
    %c0_i32_1 = arith.constant 0 : i32
    return %c0_i32, %c0_i32_0 : i32, i32
  }
  func.func @transform_10(%arg0: i32) -> (i32, i32, i32) {
    %c0_i32 = arith.constant 0 : i32
    %c0_i32_0 = arith.constant 0 : i32
    %c0_i32_1 = arith.constant 0 : i32
    return %arg0, %c0_i32, %c0_i32_0 : i32, i32, i32
  }
}

</mosaic_0001>

<bundles_post_ra>
// kernel: tpu_custom_call.1
= control target key start
LH: loop header
LB: loop body
LE: loop exit
PB: predicated region body
PF: predicated region fallthrough
CT: control target
= control target key end

     0   :  { %15 = vsyncpa [#allocation4], 0  ;;  %s7212_s0 = inlined_call_operand.vmem [shape: bf16[2,100,32], index: 0, kind: input, shape index: {}]   ;;  %s7213_s1 = inlined_call_operand.vmem [shape: f32[78,1], index: 1, kind: input, shape index: {}]   ;;  %s7214_s2 = inlined_call_operand.hbm [shape: bf16[9,32,64], index: 2, kind: input, shape index: {}]   ;;  %s7215_s3 = inlined_call_operand.vmem [shape: f32[1,64], index: 3, kind: input, shape index: {}]   ;;  %s7216_s4 = inlined_call_operand.vmem [shape: f32[1,64], index: 4, kind: input, shape index: {}]   ;;  %s7217_s5 = inlined_call_operand.vmem [shape: bf16[9,64,64], index: 5, kind: input, shape index: {}]   ;;  %s7218_s6 = inlined_call_operand.vmem [shape: f32[1,64], index: 6, kind: input, shape index: {}]   ;;  %s7219_s7 = inlined_call_operand.vmem [shape: f32[1,64], index: 7, kind: input, shape index: {}]   ;;  %s7220_s8 = inlined_call_operand.hbm [shape: bf16[64,64], index: 8, kind: input, shape index: {}]   ;;  %s7221_s9 = inlined_call_operand.vmem [shape: f32[64,1], index: 9, kind: input, shape index: {}]   ;;  %s7222_s10 = inlined_call_operand.hbm [shape: f32[2,64,100], index: 10, kind: output, shape index: {}]  }
   0x1   :  { %16 = vsyncpa [#allocation7], 0 }
   0x2   :  { %17 = vsyncpa [#allocation5], 0 }
   0x3   :  { %19 = vsyncpa [#allocation5 + $0x1], 0  ;;  %s6009_s13 = smov 0   ;;  %s6011_s14 = smov 0  }
   0x4   :  { %s6013_s15 = smov 0   ;;  %s6015_s16 = smov 0  }
   0x5 LB: > { %7230 = sst [smem:[#allocation12_spill]] %s5938_s15  ;;  %s6030_s17 = sadd.s32 4294967295, %s5942_s16   ;;  %s5942_s16 = sphi %s6015_s16, %s7252_s16   ;;  %s5938_s15 = sphi %s6013_s15, %s7254_s15   ;;  %s5934_s14 = sphi %s6011_s14, %s7256_s14   ;;  %s5930_s13 = sphi %s6009_s13, %s7255_s13  }
   0x6   : > { %s4219_s18 = sadd.s32 4294967294, %s5942_s16   ;;  %s6034_s19 = sadd.s32 1, %s5942_s16  }
   0x7   : > { %7231 = sst [smem:[#allocation13_spill]] %s6034_s19  ;;  %s247_s20 = sadd.s32 1, %s5938_s15 }
   0x8   : > { %s244_s21 = ssub.s32 %s5942_s16, %s6034_s19  ;;  %p257_p0 = scmp.ne.s32.totalorder %s5938_s15, %s5934_s14 }
   0x9   : > { %p245_p1 = scmp.eq.s32.totalorder %s244_s21, 0  ;;  %p258_p2 = scmp.eq.s32.totalorder %s6030_s17, 1 }
   0xa   : > { %p263_p3 = scmp.ne.s32.totalorder %s5934_s14, %s5930_s13  ;;  %p264_p4 = scmp.eq.s32.totalorder %s4219_s18, 1 }
   0xb   : > { %s6045_s22 = scalar_select %p245_p1, %s5938_s15, %s247_s20  }
   0xc   : > { %p6047_p5 = por %p258_p2, %p257_p0  ;;  %p6051_p6 = por %p264_p4, %p263_p3 }
   0xd   : > { %7232 = sst [smem:[#allocation14_spill]] %s6045_s22  ;;  %p4220_p7 = scmp.ge.s32.totalorder %s5942_s16, 1 }
   0xe   : > { %s7233_s23 = scalar_select %p6047_p5, 1, 0 }
   0xf   : > { %s7234_s24 = scalar_select %p6051_p6, 1, 0 }
  0x10   : > { %p271_p8 = scmp.lt.s32.totalorder %s5942_s16, 3  ;;  %p7223_p9 = scmp.eq.s32.totalorder %s6030_s17, 0 }
  0x11   : > { %7235 = sst [smem:[#allocation15_spill]] %s7234_s24  ;;  %s5944_s26 = smov [#allocation3]  }
  0x12   : > { %p6058_p10 = pnand %p4220_p7, %p271_p8  ;;  %s286_s27 = sshll.u32 %s5944_s26, 4  ;;  %s287_s27 = int_to_ptr.vmem [resolvable:$true] %s286_s27 }
  0x13   : > { %s5945_s29 = smov [#allocation6]   ;;  %s5816_s18 = scalar_lea.hbm %s7214_s2, 2304 }
  0x14   : > { %s7236_s25 = scalar_select %p6058_p10, 1, 0 }
  0x15   : > { %p5559_p11 = pneg %p6058_p10  ;;  %s314_s30 = sshll.u32 %s5945_s29, 4  ;;  %s6070_s30 = int_to_ptr.vmem [resolvable:$true] %s314_s30 }
  0x16   : > { %p5817_p13 = scmp.ne.s32.totalorder %s7214_s2, %s5816_s18  ;;  %p5823_p3 = scmp.lt.u32.totalorder %s5816_s18, %s7214_s2 }
  0x17   : > { %p6066_p12 = pnand %p7223_p9, %p5559_p11 }
  0x19   : > { %p5818_p0 = pneg %p6066_p12 }
  0x1b   : > { %p5819_p1 = pnand %p5818_p0, %p5817_p13 }
  0x1d   : > { %p5820_p2 = pneg %p5819_p1 }
  0x1f   : > { %p5825_p4 = pnand %p5823_p3, %p5820_p2 }
  0x21   : > { %5828 = shalt.err (!%p5825_p4)
}
  0x22   : > { %s5829_s29 = scalar_lea.vmem %s287_s27, 2304  ;;  %p5837_p9 = scmp.lt.s32.totalorder %s287_s27, %s287_s27 }
  0x23   : > { %p5830_p7 = scmp.ne.s32.totalorder %s287_s27, %s5829_s29  ;;  %p5838_p6 = scmp.lt.s32.totalorder %s5829_s29, %s5829_s29 }
  0x25   : > { %p5832_p8 = pnand %p5830_p7, %p5818_p0  ;;  %p5839_p5 = por %p5838_p6, %p5837_p9 }
  0x27   : > { %p5833_p11 = pneg %p5832_p8 }
  0x29   : > { %p5840_p10 = pnand %p5839_p5, %p5833_p11 }
  0x2b   : > { %5843 = shalt.err (!%p5840_p10)
}
  0x2c   : > { %s5946_s11 = smov 64   ;;  %s5947_s12 = smov 4  }
  0x2d   : > { %5562 = dma.hbm_to_vmem [thread:$0]  (!%p6066_p12), %s7214_s2, 2304, %s287_s27, [#allocation4], %s5946_s11, %s5946_s11, %s5947_s12  }
  0x2e   : > { %s5844_s26 = scalar_lea.hbm %s7220_s8, 512 }
  0x2f   : > { %p5845_p13 = scmp.ne.s32.totalorder %s7220_s8, %s5844_s26  ;;  %p5851_p9 = scmp.lt.u32.totalorder %s5844_s26, %s7220_s8 }
  0x31   : > { %p5847_p5 = pnand %p5845_p13, %p5818_p0 }
  0x33   : > { %p5848_p6 = pneg %p5847_p5 }
  0x35   : > { %p5853_p10 = pnand %p5851_p9, %p5848_p6 }
  0x37   : > { %5856 = shalt.err (!%p5853_p10)
}
  0x38   : > { %s5857_s27 = scalar_lea.vmem %s6070_s30, 512  ;;  %p5865_p4 = scmp.lt.s32.totalorder %s6070_s30, %s6070_s30 }
  0x39   : > { %p5858_p1 = scmp.ne.s32.totalorder %s6070_s30, %s5857_s27  ;;  %p5866_p7 = scmp.lt.s32.totalorder %s5857_s27, %s5857_s27 }
  0x3b   : > { %p5860_p2 = pnand %p5858_p1, %p5818_p0  ;;  %p5867_p8 = por %p5866_p7, %p5865_p4 }
  0x3d   : > { %p5861_p3 = pneg %p5860_p2 }
  0x3f   : > { %p5868_p11 = pnand %p5867_p8, %p5861_p3 }
  0x41   : > { %5871 = shalt.err (!%p5868_p11)
}
  0x42   : > { %5565 = dma.hbm_to_vmem [thread:$0]  (!%p6066_p12), %s7220_s8, 512, %s6070_s30, [#allocation7], %s5946_s11, %s5946_s11, %s5947_s12  }
  0x43   : > { %p7238_p13 = scmp.ne.s32.totalorder %s7236_s25, 0 }
  0x44   : > { %p7239_p5 = scmp.eq.s32.totalorder (!%p7238_p13), %s6030_s17, 0 }
  0x45   : > { %341 = sbr.rel (%p7238_p13) target bundleno = 1563 (0x61b), region = 60 }
  0x4c   : > { %5917 = dma.done.wait (%p7239_p5), [#allocation4], 2304   ;;  %p7240_p0 = pmov %p7239_p5 }
  0x4e   : > { %5919 = vsyncadd (%p7240_p0), [#allocation4], 4294964992  ;;  %p7241_p6 = pmov %p7240_p0 }
  0x4f   : > { %p7242_p9 = pmov %p7240_p0 }
  0x50   : > { %5921 = dma.done.wait (%p7241_p6), [#allocation7], 512  }
  0x51   : > { %5923 = vsyncadd (%p7242_p9), [#allocation7], 4294966784  ;;  %p383_p10 = scmp.lt.s32.totalorder %s6030_s17, 1  ;;  %v5948_v0 = vmov 0.0   ;;  %vm5949_vm0 = vmmov 0   ;;  %v5618_v1 = vld [vmem:[#allocation3 + $0x10] sm:$0xff]  }
  0x52   : > { %4731 = vmatprep.subr.bf16.mxu0 %v5948_v0  ;;  %4735 = vmatprep.mubr.msk.bf16.mxu0 %vm5949_vm0, %v5948_v0  ;;  %v5619_v2 = vld [vmem:[#allocation3 + $0x18] sm:$0xff]   ;;  %vm501_vm1 = vcmask 261120   ;;  %vm449_vm2 = vsmask.f32 7424  ;;  %v5622_v15 = vld [vmem:[#allocation3] sm:$0xff]   ;;  %v5624_v19 = vld [vmem:[#allocation3 + $0x8] sm:$0xff]  }
  0x53   : > { %s384_s24 = scalar_select %p383_p10, %s6030_s17, 1  ;;  %5221 = vmatprep.subr.bf16.mxu1 %v5948_v0  ;;  %4747 = vmatprep.mubr.msk.bf16.mxu1 %vm5949_vm0, %v5948_v0  ;;  %vm698_vm3 = vcmask 1046528   ;;  %v5626_v35 = vld [vmem:[#allocation3 + $0x20] sm:$0xff]   ;;  %v5627_v36 = vld [vmem:[#allocation3 + $0x28] sm:$0xff]   ;;  %v5631_v40 = vld [vmem:[#allocation3 + $0x30] sm:$0xff]   ;;  %vm1190_vm5 = vcmask 1045504  }
  0x54   : > { %4732 = vmatpush3.bf16.msra.mxu0 %v5618_v1  ;;  %5223 = vmatpush3.bf16.msra.mxu1 %v5618_v1  ;;  %v5632_v41 = vld [vmem:[#allocation3 + $0x38] sm:$0xff]   ;;  %v5635_v53 = vld [vmem:[#allocation3 + $0x40] sm:$0xff]   ;;  %v5638_v56 = vld [vmem:[#allocation3 + $0x48] sm:$0xff]   ;;  %vm1021_vm4 = vsmask.f32 6400  ;;  %vm1659_vm7 = vcmask 1044480  }
  0x55   : > { %s5548_s25 = smul.u32 52, %s384_s24  ;;  %4733 = vmatprep.subr.bf16.mxu0 %v5948_v0  ;;  %5222 = vmatprep.subr.bf16.mxu1 %v5948_v0  ;;  %vm1486_vm6 = vsmask.f32 5376  ;;  %vm389_vm8 = vcmask 519168   ;;  %vm402_vm9 = vcmask 517120   ;;  %vm2098_vm10 = vcmask 519169  }
  0x56   : > { %vm2099_vm11 = vsmask.f32 7942  ;;  %vm1985_vm12 = vsmask.f32 1280  ;;  %vm1986_vm13 = vsmask.f32 5392 }
  0x57   : > { %s6140_s11 = scalar_lea.vmem %s7212_s0, %s5548_s25  ;;  %vm6600_vm14 = vmand %vm2098_vm10, %vm2099_vm11  ;;  %vm2114_vm10 = vsmask.f32 256  ;;  %s380_s28 = sand.u32 1, %s5934_s14  }
  0x58   : > { %v404_v3 = vld [vmem:[%s6140_s11] sm:$0xf]  ;;  %v405_v4 = vld [vmem:[%s6140_s11 + $0x4] sm:$0xf]  ;;  %v5621_v6 = vld [vmem:[%s6140_s11 + $0x8] sm:$0xff]   ;;  %4734 = vmatpush3.bf16.msra.mxu0 %v5619_v2  ;;  %5224 = vmatpush3.bf16.msra.mxu1 %v5619_v2  ;;  %s4227_s30 = sshll.u32 %s380_s28, 6 }
  0x59   : > { %v4229_v5 = vcombine.low %v404_v3, %v405_v4  ;;  %v458_v9 = vshll.u32 %v5621_v6, 16  ;;  %v6148_v10 = vld [vmem:[%s6140_s11 + $0x10] sm:$0xff]   ;;  %4755 = vmatprep.subr.bf16.mxu0 %v5948_v0  ;;  %4947 = vmatprep.subr.bf16.mxu1 %v5948_v0  ;;  %v462_v16 = vshrl.u32 %v5621_v6, 16  ;;  %v6155_v20 = vld [vmem:[%s6140_s11 + $0x18] sm:$0xff]   ;;  %v689_v21 = vld [vmem:[%s6140_s11] sm:$0xe] }
  0x5a   : > { %v466_v13 = vshll.u32 %v6148_v10, 16  ;;  %v4249_v23 = vcombine.low %v689_v21, %v405_v4  ;;  %v700_v24 = vrot.slane %v5621_v6, 1  ;;  %v702_v25 = vrot.slane %v6148_v10, 1  ;;  %v412_v37 = vld [vmem:[%s6140_s11 + $0x20] sm:$0xf]  ;;  %v5634_v49 = vld [vmem:[%s6140_s11 + $0xc] sm:$0xff]   ;;  %vm6612_vm15 = vmor %vm1985_vm12, %vm1986_vm13 }
  0x5b   : > { %v451_v7 = vshrl.u32 %v4229_v5, 16  ;;  %v453_v8 = vshll.u32 %v4229_v5, 16  ;;  %v460_v12 = vrot.slane %v458_v9, 1  ;;  %v470_v29 = vshrl.u32 %v6148_v10, 16  ;;  %v413_v38 = vld [vmem:[%s6140_s11 + $0x24] sm:$0x7] }
  0x5c   : > { %v468_v18 = vrot.slane %v466_v13, 1  ;;  %v699_v26 = vrot.slane %v4249_v23, 1  ;;  %v703_v27 = vsel %vm698_vm3, %v700_v24, %v702_v25  ;;  %v474_v30 = vshll.u32 %v6155_v20, 16  ;;  %v418_v43 = vld [vmem:[%s6140_s11 + $0x24] sm:$0xf]  ;;  %v5636_v54 = vld [vmem:[%s6140_s11 + $0x14] sm:$0xff]  }
  0x5d   : > { %v455_v11 = vrot.slane %v453_v8, 1  ;;  %v464_v22 = vor.u32 %v462_v16, %v460_v12  ;;  %v4241_v39 = vcombine.low %v412_v37, %v413_v38  ;;  %v704_v42 = vrot.slane %v6155_v20, 1  ;;  %v5633_v48 = vld [vmem:[%s6140_s11 + $0x4] sm:$0xfe]   ;;  %v5637_v58 = vld [vmem:[%s6140_s11 + $0x1c] sm:$0xff]   ;;  %v6250_v4 = vld [vmem:[%s6140_s11 + $0xc] sm:$0xff]  }
  0x5e   : > { %v701_v31 = vsel %vm698_vm3, %v699_v26, %v700_v24  ;;  %v472_v32 = vor.u32 %v470_v29, %v468_v18  ;;  %v6172_v33 = vrot.slane %v474_v30, 1  ;;  %v6210_v44 = vcombine.low %v412_v37, %v418_v43  ;;  %v5639_v61 = vld [vmem:[%s6140_s11 + $0x24] sm:$0xff]   ;;  %v6258_v13 = vld [vmem:[%s6140_s11 + $0x14] sm:$0xff]   ;;  %v6267_v23 = vld [vmem:[%s6140_s11 + $0x1c] sm:$0xff]   ;;  %s382_s12 = scalar_lea.vmem [#allocation8], %s4227_s30  ;;  %s4575_s22 = sshll.u32 %s6030_s17, 10 }
  0x5f   : > { %v456_v14 = vor.u32 %v455_v11, %v451_v7  ;;  %v469_v28 = vsel %vm449_vm2, %v464_v22, %v468_v18  ;;  %v705_v45 = vsel %vm698_vm3, %v702_v25, %v704_v42  ;;  %v858_v50 = vrot.slane %v5633_v48, 1  ;;  %v977_v63 = vld [vmem:[%s6140_s11 + $0x4] sm:$0xe]  ;;  %v6245_v1 = vld [vmem:[%s6140_s11 + $0x8] sm:$0xf]  ;;  %s4135_s18 = sshll.u32 %s382_s12, 4  ;;  %s7162_s26 = scalar_lea.hbm %s7222_s10, %s4575_s22  ;;  %s7164_s18 = int_to_ptr.vmem [resolvable:$true] %s4135_s18 }
  0x60   : > { %v477_v34 = vsel %vm449_vm2, %v472_v32, %v6172_v33  ;;  %v706_v46 = vrot.slane %v6210_v44, 1  ;;  %v859_v51 = vrot.slane %v5634_v49, 1  ;;  %v861_v55 = vrot.slane %v5636_v54, 1  ;;  %s7171_s17 = scalar_lea.sflag [#allocation5], %s380_s28  ;;  %s5872_s29 = scalar_lea.vmem %s7164_s18, 1024 }
  0x61   : > { %v461_v17 = vsel %vm449_vm2, %v456_v14, %v460_v12  ;;  %v863_v59 = vrot.slane %v5637_v58, 1  ;;  %v865_v62 = vrot.slane %v5639_v61, 1  ;;  %v4269_v3 = vcombine.low %v977_v63, %v6245_v1  ;;  %p5873_p12 = scmp.ne.s32.totalorder %s7164_s18, %s5872_s29  ;;  %p7249_p1 = scmp.ne.s32.totalorder %s7233_s23, 0 }
  0x62   : > { %4736 = vmatmul.mubr.msk.bf16.vlgmr.msra.gmra.mrb[0].mxu0 %vm501_vm1, %v461_v17  ;;  %v707_v47 = vsel %vm698_vm3, %v704_v42, %v706_v46  ;;  %v860_v52 = vsel %vm698_vm3, %v858_v50, %v859_v51  ;;  %v862_v57 = vsel %vm698_vm3, %v859_v51, %v861_v55  ;;  %v1031_v7 = vshrl.u32 %v6250_v4, 16  ;;  %v5649_v51 = vld [vmem:[#allocation3 + $0x60] sm:$0xff]   ;;  %s5951_s27 = smov [#allocation8]  }
  0x63   : > { %4756 = vmatpush3.bf16.msra.mxu0 %v5622_v15  ;;  %4739 = vmatprep.mubr.msk.bf16.mxu0 %vm5949_vm0, %v5948_v0  ;;  %v864_v60 = vsel %vm698_vm3, %v861_v55, %v863_v59  ;;  %v866_v2 = vsel %vm698_vm3, %v863_v59, %v865_v62  ;;  %v1034_v8 = vshll.u32 %v6250_v4, 16  ;;  %v1040_v16 = vshrl.u32 %v6258_v13, 16  ;;  %p5874_p2 = pnand %p5873_p12, %p7249_p1 }
  0x64   : > { %4757 = vmatprep.subr.bf16.mxu0 %v5948_v0  ;;  %v1033_v11 = vrot.slane %v1031_v7, 1  ;;  %v1043_v17 = vshll.u32 %v6258_v13, 16  ;;  %v1049_v25 = vshrl.u32 %v6267_v23, 16  ;;  %v1052_v26 = vshll.u32 %v6267_v23, 16  ;;  %v1888_v7 = vld [vmem:[%s7213_s1 + $0x18] sm:$0xff] }
  0x65   : > { %v1036_v12 = vrot.slane %v1034_v8, 2  ;;  %v1042_v21 = vrot.slane %v1040_v16, 1  ;;  %v1192_v49 = vrot.slane %v6250_v4, 2  ;;  %v478_v55 = vshrl.u32 %v6155_v20, 16  ;;  %v1312_v4 = vld [vmem:[%s6140_s11 + $0x8] sm:$0xc]  ;;  %p5875_p3 = pneg %p5874_p2 }
  0x66   : > { %v1045_v22 = vrot.slane %v1043_v17, 2  ;;  %v1051_v29 = vrot.slane %v1049_v25, 1  ;;  %v1054_v30 = vrot.slane %v1052_v26, 2  ;;  %v1892_v16 = vld [vmem:[%s7213_s1 + $0x38] sm:$0xff]  ;;  %v3913_v25 = vld [vmem:[%s7221_s9] sm:$0xff]  ;;  %v3914_v26 = vld [vmem:[%s7221_s9 + $0x8] sm:$0xff] }
  0x67   : > { %4758 = vmatpush3.bf16.msra.mxu0 %v5624_v19  ;;  %v1037_v15 = vor.u32 %v1036_v12, %v1033_v11  ;;  %v5642_v19 = vld [vmem:[#allocation3 + $0x50] sm:$0xff]   ;;  %v480_v58 = vor.u32 %v478_v55, %v6172_v33 }
  0x68   : > { %4779 = vmatprep.subr.bf16.mxu0 %v5948_v0  ;;  %v1046_v24 = vor.u32 %v1045_v22, %v1042_v21  ;;  %v1055_v32 = vor.u32 %v1054_v30, %v1051_v29  ;;  %v1889_v11 = vld [vmem:[%s7213_s1 + $0x20] sm:$0xff]  ;;  %v1890_v12 = vld [vmem:[%s7213_s1 + $0x28] sm:$0xff]  ;;  %v3915_v29 = vld [vmem:[%s7221_s9 + $0x10] sm:$0xff] }
  0x69   : > { %v1893_v21 = vld [vmem:[%s7213_s1 + $0x40] sm:$0xff]  ;;  %v1894_v22 = vld [vmem:[%s7213_s1 + $0x48] sm:$0x3f]  ;;  %v3916_v30 = vld [vmem:[%s7221_s9 + $0x18] sm:$0xff] }
  0x6a   : > { %4740 = vmatmul.mubr.msk.bf16.gmra.mrb[4].mxu0 %vm501_vm1, %v469_v28  ;;  %v1047_v28 = vsel %vm1021_vm4, %v1037_v15, %v1046_v24 }
  0x6b   : > { %4743 = vmatprep.mubr.msk.bf16.mxu0 %vm5949_vm0, %v5948_v0 }
  0x72   : > { %4744 = vmatmul.mubr.msk.bf16.gmra.mrb[8].mxu0 %vm501_vm1, %v477_v34 }
  0x73   : > { %4759 = vmatprep.mubr.msk.bf16.mxu0 %vm5949_vm0, %v5948_v0 }
  0x7a   : > { %4760 = vmatmul.mubr.msk.bf16.vlgmr.msra.gmra.mrb[0].mxu0 %vm501_vm1, %v4229_v5  ;;  %v1023_v5 = vshrl.u32 %v4269_v3, 16 }
  0x7b   : > { %4780 = vmatpush3.bf16.msra.mxu0 %v5626_v35  ;;  %4763 = vmatprep.mubr.msk.bf16.mxu0 %vm5949_vm0, %v5948_v0 }
  0x7c   : > { %4781 = vmatprep.subr.bf16.mxu0 %v5948_v0  ;;  %v1025_v9 = vrot.slane %v1023_v5, 1  ;;  %v6342_v5 = vld [vmem:[%s6140_s11 + $0xc] sm:$0xf] }
  0x7f   : > { %4782 = vmatpush3.bf16.msra.mxu0 %v5627_v36  ;;  %v1056_v36 = vsel %vm1021_vm4, %v1046_v24, %v1055_v32  ;;  %v5656_v24 = vld [vmem:[#allocation3 + $0x78] sm:$0xff]  }
  0x80   : > { %4803 = vmatprep.subr.bf16.mxu0 %v5948_v0 }
  0x82   : > { %4764 = vmatmul.mubr.msk.bf16.gmra.mrb[4].mxu0 %vm501_vm1, %v5621_v6  ;;  %v1026_v6 = vshll.u32 %v4269_v3, 16  ;;  %v5950_v3 = vmov 0  }
  0x83   : > { %4767 = vmatprep.mubr.msk.bf16.mxu0 %vm5949_vm0, %v5948_v0  ;;  %5616 = vset.pattern.permute.xlu0 %v5950_v3  ;;  %391 = vst.msk [vmem:[#allocation2 + $0x4] sm:$0xf] %vm389_vm8, %v5950_v3  ;;  %390 = vst.msk [vmem:[#allocation2] sm:$0xf] %vm389_vm8, %v5950_v3 }
  0x84   : > { %5617 = vset.pattern.permute.xlu1 %v5950_v3  ;;  %392 = vst.msk [vmem:[#allocation2 + $0x8] sm:$0xf] %vm389_vm8, %v5950_v3  ;;  %393 = vst.msk [vmem:[#allocation2 + $0xc] sm:$0xf] %vm389_vm8, %v5950_v3 }
  0x85   : > { %394 = vst.msk [vmem:[#allocation2 + $0x10] sm:$0xf] %vm389_vm8, %v5950_v3  ;;  %395 = vst.msk [vmem:[#allocation2 + $0x14] sm:$0xf] %vm389_vm8, %v5950_v3 }
  0x86   : > { %396 = vst.msk [vmem:[#allocation2 + $0x18] sm:$0xf] %vm389_vm8, %v5950_v3  ;;  %397 = vst.msk [vmem:[#allocation2 + $0x1c] sm:$0xf] %vm389_vm8, %v5950_v3 }
  0x87   : > { %398 = vst.msk [vmem:[#allocation2 + $0x20] sm:$0xf] %vm389_vm8, %v5950_v3  ;;  %399 = vst.msk [vmem:[#allocation2 + $0x24] sm:$0xf] %vm389_vm8, %v5950_v3 }
  0x88   : > { %400 = vst.msk [vmem:[#allocation2 + $0x28] sm:$0xf] %vm389_vm8, %v5950_v3  ;;  %401 = vst.msk [vmem:[#allocation2 + $0x2c] sm:$0xf] %vm389_vm8, %v5950_v3 }
  0x89   : > { %403 = vst.msk [vmem:[#allocation2 + $0x30] sm:$0x3] %vm402_vm9, %v5950_v3  ;;  %vm2113_vm9 = vcmask 516096  }
  0x8a   : > { %4768 = vmatmul.mubr.msk.bf16.gmra.mrb[8].mxu0 %vm501_vm1, %v6148_v10  ;;  %v1028_v10 = vrot.slane %v1026_v6, 2  ;;  %v1886_v6 = vld [vmem:[%s7213_s1 + $0x8] sm:$0xff]  ;;  %vm6683_vm11 = vmand %vm2113_vm9, %vm2114_vm10 }
  0x8b   : > { %4771 = vmatprep.mubr.msk.bf16.mxu0 %vm5949_vm0, %v5948_v0 }
  0x8c   : > { %v1029_v14 = vor.u32 %v1028_v10, %v1025_v9  ;;  %v6353_v9 = vcombine.low %v1312_v4, %v6342_v5  ;;  %v6356_v10 = vld [vmem:[%s6140_s11 + $0x10] sm:$0xff]  }
  0x8e   : > { %v1038_v18 = vsel %vm1021_vm4, %v1029_v14, %v1037_v15  ;;  %v1357_v14 = vrot.slane %v6356_v10, 2  ;;  %v1891_v15 = vld [vmem:[%s7213_s1 + $0x30] sm:$0xff] }
  0x92   : > { %4772 = vmatmul.mubr.msk.bf16.gmra.mrb[12].mxu0 %vm501_vm1, %v6155_v20  ;;  %v486_v20 = vshrl.u32 %v6210_v44, 16 }
  0x93   : > { %4775 = vmatprep.mubr.msk.bf16.mxu0 %vm5949_vm0, %v5948_v0 }
  0x9a   : > { %4776 = vmatmul.mubr.msk.bf16.gmra.mrb[16].mxu0 %vm501_vm1, %v4241_v39 }
  0x9b   : > { %4783 = vmatprep.mubr.msk.bf16.mxu0 %vm5949_vm0, %v5948_v0 }
  0xa2   : > { %4784 = vmatmul.mubr.msk.bf16.vlgmr.msra.gmra.mrb[0].mxu0 %vm501_vm1, %v701_v31  ;;  %v6277_v31 = vld [vmem:[%s6140_s11 + $0x24] sm:$0xff]  }
  0xa3   : > { %4804 = vmatpush3.bf16.msra.mxu0 %v5631_v40  ;;  %4787 = vmatprep.mubr.msk.bf16.mxu0 %vm5949_vm0, %v5948_v0  ;;  %v1058_v34 = vshrl.u32 %v6277_v31, 16  ;;  %v1061_v35 = vshll.u32 %v6277_v31, 16  ;;  %v5647_v40 = vld [vmem:[%s6140_s11 + $0x2c] ss:$0 sps:$4 sm:$0x11]   ;;  %v1198_v33 = vrot.slane %v6277_v31, 2 }
  0xa4   : > { %4805 = vmatprep.subr.bf16.mxu0 %v5948_v0  ;;  %v1067_v42 = vshll.u32 %v5647_v40, 16 }
  0xa5   : > { %v1060_v37 = vrot.slane %v1058_v34, 1  ;;  %v1063_v38 = vrot.slane %v1061_v35, 2  ;;  %v3918_v34 = vld [vmem:[%s7221_s9 + $0x28] sm:$0xff] }
  0xa6   : > { %v1069_v43 = vrot.slane %v1067_v42, 2 }
  0xa7   : > { %4806 = vmatpush3.bf16.msra.mxu0 %v5632_v41  ;;  %v1064_v39 = vor.u32 %v1063_v38, %v1060_v37  ;;  %v3919_v37 = vld [vmem:[%s7221_s9 + $0x30] sm:$0xff]  ;;  %v3920_v38 = vld [vmem:[%s7221_s9 + $0x38] sm:$0xff] }
  0xa8   : > { %4827 = vmatprep.subr.bf16.mxu0 %v5948_v0 }
  0xa9   : > { %v1065_v41 = vsel %vm1021_vm4, %v1055_v32, %v1064_v39  ;;  %v3917_v32 = vld [vmem:[%s7221_s9 + $0x20] sm:$0xff] }
  0xaa   : > { %4788 = vmatmul.mubr.msk.bf16.gmra.mrb[4].mxu0 %vm501_vm1, %v703_v27  ;;  %v5645_v27 = vld [vmem:[#allocation3 + $0x58] sm:$0xff]  }
  0xab   : > { %4791 = vmatprep.mubr.msk.bf16.mxu0 %vm5949_vm0, %v5948_v0 }
  0xb2   : > { %4792 = vmatmul.mubr.msk.bf16.gmra.mrb[8].mxu0 %vm501_vm1, %v705_v45  ;;  %v1181_v45 = vld [vmem:[%s6140_s11 + $0x4] sm:$0xc] }
  0xb3   : > { %4795 = vmatprep.mubr.msk.bf16.mxu0 %vm5949_vm0, %v5948_v0 }
  0xba   : > { %4796 = vmatmul.mubr.msk.bf16.gmra.mrb[12].mxu0 %vm501_vm1, %v707_v47  ;;  %v4282_v47 = vcombine.low %v1181_v45, %v6245_v1  ;;  %v1887_v1 = vld [vmem:[%s7213_s1 + $0x10] sm:$0xff]  ;;  %v1491_v45 = vshll.u32 %v6353_v9, 16 }
  0xbb   : > { %4799 = vmatprep.mubr.msk.bf16.mxu0 %vm5949_vm0, %v5948_v0  ;;  %1907 = vperm.xlu1 %5617, %v1887_v1  }
  0xbc   : > { %v1191_v48 = vrot.slane %v4282_v47, 2  ;;  %v1499_v47 = vshll.u32 %v6356_v10, 16 }
  0xbe   : > { %v1193_v50 = vsel %vm1190_vm5, %v1191_v48, %v1192_v49 }
  0xbf   : > { %1912 = vperm.xlu1 %5617, %v1888_v7  }
  0xc2   : > { %4800 = vmatmul.mubr.msk.bf16.gmra.mrb[16].mxu0 %vm501_vm1, %v706_v46  ;;  %v1070_v46 = vsel %vm1021_vm4, %v1064_v39, %v1069_v43  ;;  %v1488_v43 = vshrl.u32 %v6353_v9, 16 }
  0xc3   : > { %4807 = vmatprep.mubr.msk.bf16.mxu0 %vm5949_vm0, %v5948_v0  ;;  %1922 = vperm.xlu1 %5617, %v1890_v12  }
  0xc7   : > { %1932 = vperm.xlu1 %5617, %v1892_v16  }
  0xca   : > { %4808 = vmatmul.mubr.msk.bf16.vlgmr.msra.gmra.mrb[0].mxu0 %vm501_vm1, %v860_v52  ;;  %v1194_v52 = vrot.slane %v6258_v13, 2  ;;  %v1356_v13 = vrot.slane %v6353_v9, 2 }
  0xcb   : > { %4828 = vmatpush3.bf16.msra.mxu0 %v5635_v53  ;;  %4811 = vmatprep.mubr.msk.bf16.mxu0 %vm5949_vm0, %v5948_v0  ;;  %v5650_v53 = vld [vmem:[#allocation3 + $0x68] sm:$0xff]  }
  0xcc   : > { %4829 = vmatprep.subr.bf16.mxu0 %v5948_v0  ;;  %v1195_v54 = vsel %vm1190_vm5, %v1192_v49, %v1194_v52  ;;  %v1358_v17 = vsel %vm1190_vm5, %v1356_v13, %v1357_v14  ;;  %1942 = vperm.xlu1 %5617, %v1894_v22   ;;  %v1490_v49 = vrot.slane %v1488_v43, 2  ;;  %v5665_v43 = vld [vmem:[%s7217_s5 + $0x30] sm:$0xff]  }
  0xcf   : > { %4830 = vmatpush3.bf16.msra.mxu0 %v5638_v56  ;;  %v482_v56 = vshll.u32 %v6210_v44, 16  ;;  %v1885_v44 = vld [vmem:[%s7213_s1] sm:$0xff] }
  0xd0   : > { %4851 = vmatprep.subr.bf16.mxu0 %v5948_v0  ;;  %1897 = vperm.xlu0 %5616, %v1885_v44  }
  0xd1   : > { %v484_v59 = vrot.slane %v482_v56, 1  ;;  %3928 = vperm.xlu1 %5617, %v3914_v26  }
  0xd2   : > { %4812 = vmatmul.mubr.msk.bf16.gmra.mrb[4].mxu0 %vm501_vm1, %v862_v57  ;;  %v1196_v57 = vrot.slane %v6267_v23, 2 }
  0xd3   : > { %4815 = vmatprep.mubr.msk.bf16.mxu0 %vm5949_vm0, %v5948_v0 }
  0xd4   : > { %v1197_v61 = vsel %vm1190_vm5, %v1194_v52, %v1196_v57  ;;  %v1199_v63 = vsel %vm1190_vm5, %v1196_v57, %v1198_v33  ;;  %1902 = vperm.xlu0 %5616, %v1886_v6   ;;  %v1501_v52 = vrot.slane %v1499_v47, 3 }
  0xd5   : > { %3938 = vperm.xlu1 %5617, %v3916_v30  }
  0xd8   : > { %1917 = vperm.xlu0 %5616, %v1889_v11   ;;  %v5661_v11 = vld [vmem:[%s6140_s11 + $0x30] ss:$0 sps:$4 sm:$0x33]  }
  0xd9   : > { %3948 = vperm.xlu1 %5617, %v3918_v34   ;;  %v1532_v13 = vshrl.u32 %v5661_v11, 16 }
  0xda   : > { %4816 = vmatmul.mubr.msk.bf16.gmra.mrb[8].mxu0 %vm501_vm1, %v864_v60  ;;  %v485_v60 = vsel %vm449_vm2, %v480_v58, %v484_v59  ;;  %v5659_v58 = vld [vmem:[#allocation3 + $0x80] sm:$0xff]  }
  0xdb   : > { %4819 = vmatprep.mubr.msk.bf16.mxu0 %vm5949_vm0, %v5948_v0  ;;  %4748 = vmatmul.mubr.msk.bf16.vlgmr.msra.gmra.mrb[0].mxu1 %vm501_vm1, %v485_v60  ;;  %v1534_v16 = vrot.slane %v1532_v13, 2 }
  0xdc   : > { %4751 = vmatprep.mubr.msk.bf16.mxu1 %vm5949_vm0, %v5948_v0  ;;  %1927 = vperm.xlu0 %5616, %v1891_v15  }
  0xdd   : > { %3958 = vperm.xlu1 %5617, %v3920_v38  }
  0xe0   : > { %1937 = vperm.xlu0 %5616, %v1893_v21   ;;  %v1650_v21 = vld [vmem:[%s6140_s11 + $0x8] sm:$0x8] }
  0xe2   : > { %4820 = vmatmul.mubr.msk.bf16.gmra.mrb[12].mxu0 %vm501_vm1, %v866_v2  ;;  %v1200_v2 = vrot.slane %v5647_v40, 2  ;;  %v5658_v40 = vld [vmem:[%s6140_s11 + $0x30] ss:$0 sps:$4 sm:$0x11]  }
  0xe3   : > { %4823 = vmatprep.mubr.msk.bf16.mxu0 %vm5949_vm0, %v5948_v0  ;;  %v1365_v42 = vrot.slane %v5658_v40, 2 }
  0xe4   : > { %v1201_v8 = vsel %vm1190_vm5, %v1198_v33, %v1200_v2  ;;  %3923 = vperm.xlu0 %5616, %v3913_v25   ;;  %v1661_v25 = vrot.slane %v6356_v10, 3 }
  0xe8   : > { %3933 = vperm.xlu0 %5616, %v3915_v29  }
  0xea   : > { %4824 = vmatmul.mubr.msk.bf16.gmra.mrb[16].mxu0 %vm501_vm1, %v865_v62  ;;  %v488_v62 = vor.u32 %v486_v20, %v484_v59 }
  0xeb   : > { %4831 = vmatprep.mubr.msk.bf16.mxu0 %vm5949_vm0, %v5948_v0 }
  0xec   : > { %4752 = vmatmul.mubr.msk.bf16.gmra.mrb[4].mxu1 %vm501_vm1, %v488_v62  ;;  %3943 = vperm.xlu0 %5616, %v3917_v32   ;;  %v5660_v62 = vld [vmem:[#allocation3 + $0x88] sm:$0xff]  }
  0xed   : > { %4955 = vmatprep.mubr.msk.bf16.mxu1 %vm5949_vm0, %v5948_v0 }
  0xf0   : > { %3953 = vperm.xlu0 %5616, %v3919_v37  }
  0xf2   : > { %4832 = vmatmul.mubr.msk.bf16.vlgmr.msra.gmra.mrb[0].mxu0 %vm501_vm1, %v1038_v18  ;;  %v5653_v18 = vld [vmem:[#allocation3 + $0x70] sm:$0xff]  }
  0xf3   : > { %4852 = vmatpush3.bf16.msra.mxu0 %v5642_v19  ;;  %4835 = vmatprep.mubr.msk.bf16.mxu0 %vm5949_vm0, %v5948_v0  ;;  %v6377_v19 = vld [vmem:[%s6140_s11 + $0x18] sm:$0xff]  }
  0xf4   : > { %4853 = vmatprep.subr.bf16.mxu0 %v5948_v0  ;;  %v1359_v23 = vrot.slane %v6377_v19, 2  ;;  %v1505_v55 = vshrl.u32 %v6377_v19, 16  ;;  %v1508_v56 = vshll.u32 %v6377_v19, 16 }
  0xf6   : > { %v1507_v59 = vrot.slane %v1505_v55, 2  ;;  %v1510_v60 = vrot.slane %v1508_v56, 3 }
  0xf7   : > { %4854 = vmatpush3.bf16.msra.mxu0 %v5645_v27  ;;  %v1360_v27 = vsel %vm1190_vm5, %v1357_v14, %v1359_v23  ;;  %v1535_v14 = vshll.u32 %v5661_v11, 16 }
  0xf8   : > { %4875 = vmatprep.subr.bf16.mxu0 %v5948_v0 }
  0xfa   : > { %4836 = vmatmul.mubr.msk.bf16.gmra.mrb[4].mxu0 %vm501_vm1, %v1047_v28  ;;  %v6398_v28 = vld [vmem:[%s6140_s11 + $0x20] sm:$0xff]  }
  0xfb   : > { %4839 = vmatprep.mubr.msk.bf16.mxu0 %vm5949_vm0, %v5948_v0  ;;  %v1361_v31 = vrot.slane %v6398_v28, 2  ;;  %v1514_v20 = vshrl.u32 %v6398_v28, 16  ;;  %v1517_v33 = vshll.u32 %v6398_v28, 16  ;;  %v1665_v29 = vrot.slane %v6398_v28, 3 }
  0xfd   : > { %v1362_v35 = vsel %vm1190_vm5, %v1359_v23, %v1361_v31  ;;  %v1516_v44 = vrot.slane %v1514_v20, 2  ;;  %v1519_v1 = vrot.slane %v1517_v33, 3  ;;  %v4311_v23 = vcombine.low %v1650_v21, %v6342_v5 }
  0xff   : > { %v1520_v2 = vor.u32 %v1519_v1, %v1516_v44 }
 0x102   : > { %4840 = vmatmul.mubr.msk.bf16.gmra.mrb[8].mxu0 %vm501_vm1, %v1056_v36  ;;  %v6419_v36 = vld [vmem:[%s6140_s11 + $0x28] sm:$0xff]   ;;  %s5876_s11 = sshll.u32 %s5951_s27, 4  ;;  %s5877_s11 = int_to_ptr.vmem [resolvable:$false] %s5876_s11 }
 0x103   : > { %4843 = vmatprep.mubr.msk.bf16.mxu0 %vm5949_vm0, %v5948_v0  ;;  %v1363_v39 = vrot.slane %v6419_v36, 2  ;;  %v1523_v4 = vshrl.u32 %v6419_v36, 16  ;;  %v1526_v6 = vshll.u32 %v6419_v36, 16  ;;  %v1667_v30 = vrot.slane %v6419_v36, 3  ;;  %s5878_s15 = scalar_lea.vmem %s5877_s11, 2048  ;;  %p5879_p4 = scmp.lt.s32.totalorder %s7164_s18, %s5877_s11 }
 0x104   : > { %p5880_p7 = scmp.lt.s32.totalorder %s5878_s15, %s5872_s29 }
 0x105   : > { %v1366_v48 = vsel %vm1190_vm5, %v1363_v39, %v1365_v42  ;;  %v1528_v9 = vrot.slane %v1526_v6, 3  ;;  %v5664_v42 = vld [vmem:[%s7217_s5 + $0x28] sm:$0xff]  }
 0x106   : > { %p5881_p8 = por %p5880_p7, %p5879_p4 }
 0x108   : > { %p5882_p11 = pnand %p5881_p8, %p5875_p3 }
 0x10a   : > { %4844 = vmatmul.mubr.msk.bf16.gmra.mrb[12].mxu0 %vm501_vm1, %v1065_v41  ;;  %v1364_v41 = vsel %vm1190_vm5, %v1361_v31, %v1363_v39  ;;  %v1669_v31 = vrot.slane %v5661_v11, 3 }
 0x10b   : > { %4847 = vmatprep.mubr.msk.bf16.mxu0 %vm5949_vm0, %v5948_v0 }
 0x10c   : > { %v1670_v32 = vsel %vm1659_vm7, %v1667_v30, %v1669_v31 }
 0x112   : > { %4848 = vmatmul.mubr.msk.bf16.gmra.mrb[16].mxu0 %vm501_vm1, %v1070_v46  ;;  %v1496_v46 = vshrl.u32 %v6356_v10, 16 }
 0x113   : > { %4855 = vmatprep.mubr.msk.bf16.mxu0 %vm5949_vm0, %v5948_v0 }
 0x11a   : > { %4856 = vmatmul.mubr.msk.bf16.vlgmr.msra.gmra.mrb[0].mxu0 %vm501_vm1, %v1193_v50  ;;  %v1493_v50 = vrot.slane %v1491_v45, 3  ;;  %v5666_v45 = vld [vmem:[%s7217_s5 + $0x38] sm:$0xff]  }
 0x11b   : > { %4876 = vmatpush3.bf16.msra.mxu0 %v5649_v51  ;;  %4859 = vmatprep.mubr.msk.bf16.mxu0 %vm5949_vm0, %v5948_v0  ;;  %v1498_v51 = vrot.slane %v1496_v46, 2  ;;  %v6548_v46 = vld [vmem:[%s7215_s3] ss:$0 sm:$0xff] }
 0x11c   : > { %4877 = vmatprep.subr.bf16.mxu0 %v5948_v0 }
 0x11f   : > { %4878 = vmatpush3.bf16.msra.mxu0 %v5650_v53  ;;  %v1494_v53 = vor.u32 %v1493_v50, %v1490_v49 }
 0x120   : > { %4899 = vmatprep.subr.bf16.mxu0 %v5948_v0 }
 0x122   : > { %4860 = vmatmul.mubr.msk.bf16.gmra.mrb[4].mxu0 %vm501_vm1, %v1195_v54  ;;  %v1502_v54 = vor.u32 %v1501_v52, %v1498_v51 }
 0x123   : > { %4863 = vmatprep.mubr.msk.bf16.mxu0 %vm5949_vm0, %v5948_v0 }
 0x124   : > { %v1503_v57 = vsel %vm1486_vm6, %v1494_v53, %v1502_v54 }
 0x12a   : > { %4864 = vmatmul.mubr.msk.bf16.gmra.mrb[8].mxu0 %vm501_vm1, %v1197_v61  ;;  %v1511_v61 = vor.u32 %v1510_v60, %v1507_v59 }
 0x12b   : > { %4867 = vmatprep.mubr.msk.bf16.mxu0 %vm5949_vm0, %v5948_v0 }
 0x12c   : > { %v1521_v7 = vsel %vm1486_vm6, %v1511_v61, %v1520_v2 }
 0x132   : > { %4868 = vmatmul.mubr.msk.bf16.gmra.mrb[12].mxu0 %vm501_vm1, %v1199_v63  ;;  %v1512_v63 = vsel %vm1486_vm6, %v1502_v54, %v1511_v61 }
 0x133   : > { %4871 = vmatprep.mubr.msk.bf16.mxu0 %vm5949_vm0, %v5948_v0 }
 0x13a   : > { %4872 = vmatmul.mubr.msk.bf16.gmra.mrb[16].mxu0 %vm501_vm1, %v1201_v8  ;;  %v1525_v8 = vrot.slane %v1523_v4, 2 }
 0x13b   : > { %4879 = vmatprep.mubr.msk.bf16.mxu0 %vm5949_vm0, %v5948_v0 }
 0x13c   : > { %v1529_v12 = vor.u32 %v1528_v9, %v1525_v8 }
 0x13e   : > { %v1530_v15 = vsel %vm1486_vm6, %v1520_v2, %v1529_v12 }
 0x142   : > { %4880 = vmatmul.mubr.msk.bf16.vlgmr.msra.gmra.mrb[0].mxu0 %vm501_vm1, %v1358_v17  ;;  %v1537_v17 = vrot.slane %v1535_v14, 3 }
 0x143   : > { %4900 = vmatpush3.bf16.msra.mxu0 %v5653_v18  ;;  %4883 = vmatprep.mubr.msk.bf16.mxu0 %vm5949_vm0, %v5948_v0 }
 0x144   : > { %4901 = vmatprep.subr.bf16.mxu0 %v5948_v0  ;;  %v1538_v18 = vor.u32 %v1537_v17, %v1534_v16 }
 0x146   : > { %v1539_v22 = vsel %vm1486_vm6, %v1529_v12, %v1538_v18 }
 0x147   : > { %4902 = vmatpush3.bf16.msra.mxu0 %v5656_v24  ;;  %v1660_v24 = vrot.slane %v4311_v23, 3 }
 0x148   : > { %4923 = vmatprep.subr.bf16.mxu0 %v5948_v0 }
 0x149   : > { %v1662_v26 = vsel %vm1659_vm7, %v1660_v24, %v1661_v25 }
 0x14a   : > { %4884 = vmatmul.mubr.msk.bf16.gmra.mrb[4].mxu0 %vm501_vm1, %v1360_v27  ;;  %v1663_v27 = vrot.slane %v6377_v19, 3  ;;  %v1668_v19 = vsel %vm1659_vm7, %v1665_v29, %v1667_v30 }
 0x14b   : > { %4887 = vmatprep.mubr.msk.bf16.mxu0 %vm5949_vm0, %v5948_v0 }
 0x14c   : > { %v1664_v5 = vsel %vm1659_vm7, %v1661_v25, %v1663_v27  ;;  %v1666_v10 = vsel %vm1659_vm7, %v1663_v27, %v1665_v29 }
 0x152   : > { %4888 = vmatmul.mubr.msk.bf16.gmra.mrb[8].mxu0 %vm501_vm1, %v1362_v35 }
 0x153   : > { %4891 = vmatprep.mubr.msk.bf16.mxu0 %vm5949_vm0, %v5948_v0 }
 0x15a   : > { %4892 = vmatmul.mubr.msk.bf16.gmra.mrb[12].mxu0 %vm501_vm1, %v1364_v41  ;;  %v5663_v41 = vld [vmem:[%s7217_s5 + $0x20] sm:$0xff]  }
 0x15b   : > { %4895 = vmatprep.mubr.msk.bf16.mxu0 %vm5949_vm0, %v5948_v0  ;;  %4948 = vmatpush3.bf16.msra.mxu1 %v5663_v41 }
 0x15c   : > { %4949 = vmatprep.subr.bf16.mxu1 %v5948_v0 }
 0x15f   : > { %4950 = vmatpush3.bf16.msra.mxu1 %v5664_v42 }
 0x160   : > { %4951 = vmatprep.subr.bf16.mxu1 %v5948_v0 }
 0x162   : > { %4896 = vmatmul.mubr.msk.bf16.gmra.mrb[16].mxu0 %vm501_vm1, %v1366_v48  ;;  %v6553_v48 = vld [vmem:[%s7216_s4] ss:$0 sm:$0xff] }
 0x163   : > { %4903 = vmatprep.mubr.msk.bf16.mxu0 %vm5949_vm0, %v5948_v0  ;;  %4952 = vmatpush3.bf16.msra.mxu1 %v5665_v43 }
 0x164   : > { %4953 = vmatprep.subr.bf16.mxu1 %v5948_v0 }
 0x167   : > { %4954 = vmatpush3.bf16.msra.mxu1 %v5666_v45 }
 0x168   : > { %4975 = vmatprep.subr.bf16.mxu1 %v5948_v0 }
 0x16a   : > { %4904 = vmatmul.mubr.msk.bf16.vlgmr.msra.gmra.mrb[0].mxu0 %vm501_vm1, %v1503_v57 }
 0x16b   : > { %4924 = vmatpush3.bf16.msra.mxu0 %v5659_v58  ;;  %4907 = vmatprep.mubr.msk.bf16.mxu0 %vm5949_vm0, %v5948_v0 }
 0x16c   : > { %4925 = vmatprep.subr.bf16.mxu0 %v5948_v0 }
 0x16f   : > { %4926 = vmatpush3.bf16.msra.mxu0 %v5660_v62 }
 0x172   : > { %4908 = vmatmul.mubr.msk.bf16.gmra.mrb[4].mxu0 %vm501_vm1, %v1512_v63 }
 0x173   : > { %4911 = vmatprep.mubr.msk.bf16.mxu0 %vm5949_vm0, %v5948_v0 }
 0x17a   : > { %4912 = vmatmul.mubr.msk.bf16.gmra.mrb[8].mxu0 %vm501_vm1, %v1521_v7 }
 0x17b   : > { %4915 = vmatprep.mubr.msk.bf16.mxu0 %vm5949_vm0, %v5948_v0 }
 0x182   : > { %4916 = vmatmul.mubr.msk.bf16.gmra.mrb[12].mxu0 %vm501_vm1, %v1530_v15 }
 0x183   : > { %4919 = vmatprep.mubr.msk.bf16.mxu0 %vm5949_vm0, %v5948_v0 }
 0x18a   : > { %4920 = vmatmul.mubr.msk.bf16.gmra.mrb[16].mxu0 %vm501_vm1, %v1539_v22 }
 0x18b   : > { %4927 = vmatprep.mubr.msk.bf16.mxu0 %vm5949_vm0, %v5948_v0 }
 0x192   : > { %4928 = vmatmul.mubr.msk.bf16.vlgmr.msra.gmra.mrb[0].mxu0 %vm501_vm1, %v1662_v26 }
 0x193   : > { %4931 = vmatprep.mubr.msk.bf16.mxu0 %vm5949_vm0, %v5948_v0 }
 0x19a   : > { %4932 = vmatmul.mubr.msk.bf16.gmra.mrb[4].mxu0 %vm501_vm1, %v1664_v5 }
 0x19b   : > { %4935 = vmatprep.mubr.msk.bf16.mxu0 %vm5949_vm0, %v5948_v0 }
 0x1a2   : > { %4936 = vmatmul.mubr.msk.bf16.gmra.mrb[8].mxu0 %vm501_vm1, %v1666_v10  ;;  %v1898_v10 = vpop.permute.xlu0 %1897 }
 0x1a3   : > { %4939 = vmatprep.mubr.msk.bf16.mxu0 %vm5949_vm0, %v5948_v0 }
 0x1aa   : > { %4940 = vmatmul.mubr.msk.bf16.gmra.mrb[12].mxu0 %vm501_vm1, %v1668_v19 }
 0x1ab   : > { %4943 = vmatprep.mubr.msk.bf16.mxu0 %vm5949_vm0, %v5948_v0 }
 0x1ae   : > { %v6496_v28 = vpop.f32.mrb[0].mxu1 }
 0x1af   : > { %v4749_v34 = vpop.f32.mrb[1].mxu1 }
 0x1b0   : > { %v6522_v35 = vpop.f32.mrb[2].mxu1 }
 0x1b1   : > { %v4750_v36 = vpop.f32.mrb[3].mxu1 }
 0x1b2   : > { %4944 = vmatmul.mubr.msk.bf16.gmra.mrb[16].mxu0 %vm501_vm1, %v1670_v32  ;;  %vm2235_vm1 = vcmask 523264  }
 0x1bf   : > { %v6524_v37 = vpop.f32.mrb[4].mxu1 }
 0x1c0   : > { %v4753_v38 = vpop.f32.mrb[5].mxu1 }
 0x1c1   : > { %v6526_v39 = vpop.f32.mrb[6].mxu1 }
 0x1c2   : > { %v4754_v40 = vpop.f32.mrb[7].mxu1 }
 0x265   : > { %v1732_v47 = vpop.f32.mrb[0].mxu0 }
 0x266   : > { %v1788_v49 = vmul.f32 %v6548_v46, %v1732_v47  ;;  %v4929_v50 = vpop.f32.mrb[1].mxu0  ;;  %v1903_v47 = vpop.permute.xlu0 %1902 }
 0x267   : > { %v1735_v51 = vpop.f32.mrb[2].mxu0 }
 0x268   : > { %v1805_v52 = vadd.f32 %v6553_v48, %v1788_v49  ;;  %v1789_v53 = vmul.f32 %v6548_v46, %v1735_v51  ;;  %v4930_v3 = vpop.f32.mrb[3].mxu0 }
 0x26a   : > { %v4321_v54 = vmul.f32 -1.442695, %v1805_v52  ;;  %v1806_v55 = vadd.f32 %v6553_v48, %v1789_v53 }
 0x26c   : > { %5736 = vpow2.f32 %v4321_v54  ;;  %v4322_v56 = vmul.f32 -1.442695, %v1806_v55 }
 0x26d   : > { %v1740_v57 = vpop.f32.mrb[4].mxu0 }
 0x26e   : > { %5738 = vpow2.f32 %v4322_v56  ;;  %v1790_v58 = vmul.f32 %v6548_v46, %v1740_v57  ;;  %v4933_v59 = vpop.f32.mrb[5].mxu0  ;;  %v1908_v57 = vpop.permute.xlu1 %1907 }
 0x26f   : > { %v1743_v60 = vpop.f32.mrb[6].mxu0 }
 0x270   : > { %v6561_v61 = vadd.f32 %v6553_v48, %v1790_v58  ;;  %v1791_v20 = vmul.f32 %v6548_v46, %v1743_v60  ;;  %v4934_v33 = vpop.f32.mrb[7].mxu0 }
 0x272   : > { %v4323_v62 = vmul.f32 -1.442695, %v6561_v61  ;;  %v6566_v63 = vadd.f32 %v6553_v48, %v1791_v20 }
 0x274   : > { %5740 = vpow2.f32 %v4323_v62  ;;  %v4324_v44 = vmul.f32 -1.442695, %v6566_v63 }
 0x275   : > { %v1748_v1 = vpop.f32.mrb[8].mxu0 }
 0x276   : > { %v5737_v2 = vpop.eup %5736  ;;  %5742 = vpow2.f32 %v4324_v44  ;;  %v1792_v4 = vmul.f32 %v6548_v46, %v1748_v1  ;;  %v4937_v6 = vpop.f32.mrb[9].mxu0 }
 0x277   : > { %v1845_v7 = vadd.f32 1.0, %v5737_v2  ;;  %v1751_v8 = vpop.f32.mrb[10].mxu0 }
 0x278   : > { %v5739_v9 = vpop.eup %5738  ;;  %v6571_v11 = vadd.f32 %v6553_v48, %v1792_v4  ;;  %v1793_v12 = vmul.f32 %v6548_v46, %v1751_v8  ;;  %v4938_v13 = vpop.f32.mrb[11].mxu0 }
 0x279   : > { %5744 = vrcp.f32 %v1845_v7  ;;  %v1846_v14 = vadd.f32 1.0, %v5739_v9  ;;  %v2101_v7 = vld [vmem:[#allocation2 + $0x4] sm:$0xe] }
 0x27a   : > { %v4325_v15 = vmul.f32 -1.442695, %v6571_v11  ;;  %v6576_v16 = vadd.f32 %v6553_v48, %v1793_v12 }
 0x27b   : > { %5746 = vrcp.f32 %v1846_v14 }
 0x27c   : > { %5748 = vpow2.f32 %v4325_v15  ;;  %v4326_v17 = vmul.f32 -1.442695, %v6576_v16 }
 0x27d   : > { %v1756_v18 = vpop.f32.mrb[12].mxu0 }
 0x27e   : > { %v5741_v21 = vpop.eup %5740  ;;  %5750 = vpow2.f32 %v4326_v17  ;;  %v5225_v22 = vadd.f32 %v1756_v18, %v6496_v28  ;;  %v4941_v23 = vpop.f32.mrb[13].mxu0 }
 0x27f   : > { %v1847_v24 = vadd.f32 1.0, %v5741_v21  ;;  %v1759_v25 = vpop.f32.mrb[14].mxu0  ;;  %v1913_v21 = vpop.permute.xlu1 %1912 }
 0x280   : > { %v5743_v26 = vpop.eup %5742  ;;  %v1794_v27 = vmul.f32 %v5225_v22, %v6548_v46  ;;  %v5226_v5 = vadd.f32 %v1759_v25, %v6522_v35  ;;  %v4942_v29 = vpop.f32.mrb[15].mxu0 }
 0x281   : > { %5752 = vrcp.f32 %v1847_v24  ;;  %v1848_v30 = vadd.f32 1.0, %v5743_v26 }
 0x282   : > { %v6583_v19 = vadd.f32 %v6553_v48, %v1794_v27  ;;  %v1795_v31 = vmul.f32 %v5226_v5, %v6548_v46 }
 0x283   : > { %v5745_v32 = vpop.eup %5744  ;;  %5754 = vrcp.f32 %v1848_v30 }
 0x284   : > { %v1875_v28 = vmul.f32 %v5745_v32, %v1805_v52  ;;  %v4327_v34 = vmul.f32 -1.442695, %v6583_v19  ;;  %v6588_v36 = vadd.f32 %v6553_v48, %v1795_v31 }
 0x285   : > { %v5747_v38 = vpop.eup %5746  ;;  %v1764_v40 = vpop.f32.mrb[16].mxu0 }
 0x286   : > { %v5749_v35 = vpop.eup %5748  ;;  %v1945_v41 = vmul.f32 %v1898_v10, %v1875_v28  ;;  %v1876_v42 = vmul.f32 %v5747_v38, %v1806_v55  ;;  %5756 = vpow2.f32 %v4327_v34  ;;  %v4328_v43 = vmul.f32 -1.442695, %v6588_v36  ;;  %v4945_v45 = vpop.f32.mrb[17].mxu0 }
 0x287   : > { %v1849_v49 = vadd.f32 1.0, %v5749_v35  ;;  %v5227_v50 = vadd.f32 %v1764_v40, %v6524_v37  ;;  %v1767_v51 = vpop.f32.mrb[18].mxu0 }
 0x288   : > { %v5751_v52 = vpop.eup %5750  ;;  %v4555_v53 = vpack.c.bf16 %v1945_v41, %v1945_v41  ;;  %v1946_v3 = vmul.f32 %v1903_v47, %v1876_v42  ;;  %5758 = vpow2.f32 %v4328_v43  ;;  %v5228_v54 = vadd.f32 %v1767_v51, %v6526_v39  ;;  %v4946_v56 = vpop.f32.mrb[19].mxu0 }
 0x289   : > { %5760 = vrcp.f32 %v1849_v49  ;;  %v1850_v55 = vadd.f32 1.0, %v5751_v52  ;;  %v1796_v58 = vmul.f32 %v5227_v50, %v6548_v46  ;;  %v1918_v42 = vpop.permute.xlu0 %1917  ;;  %v2119_v50 = vld [vmem:[#allocation2] sm:$0xf] }
 0x28a   : > { %v1989_v59 = vshrl.u32 %v4555_v53, 16  ;;  %v1992_v60 = vshll.u32 %v4555_v53, 16  ;;  %v4556_v20 = vpack.c.bf16 %v1946_v3, %v1946_v3  ;;  %v1797_v33 = vmul.f32 %v5228_v54, %v6548_v46  ;;  %v1923_v53 = vpop.permute.xlu1 %1922 }
 0x28b   : > { %v5753_v37 = vpop.eup %5752  ;;  %5762 = vrcp.f32 %v1850_v55  ;;  %v6596_v62 = vadd.f32 %v6553_v48, %v1796_v58 }
 0x28c   : > { %v1991_v39 = vrot.slane %v1989_v59, 6  ;;  %v1994_v44 = vrot.slane %v1992_v60, 7  ;;  %v1998_v1 = vshrl.u32 %v4556_v20, 16  ;;  %v2001_v2 = vshll.u32 %v4556_v20, 16 }
 0x28d   : > { %v5755_v4 = vpop.eup %5754  ;;  %v1877_v46 = vmul.f32 %v5753_v37, %v6561_v61  ;;  %v4329_v8 = vmul.f32 -1.442695, %v6596_v62  ;;  %v6607_v9 = vadd.f32 %v6553_v48, %v1797_v33 }
 0x28e   : > { %v1995_v12 = vor.u32 %v1994_v44, %v1991_v39  ;;  %v2000_v13 = vrot.slane %v1998_v1, 6  ;;  %v2003_v14 = vrot.slane %v2001_v2, 7  ;;  %v1878_v15 = vmul.f32 %v5755_v4, %v6566_v63 }
 0x28f   : > { %v1947_v18 = vmul.f32 %v1908_v57, %v1877_v46  ;;  %5764 = vpow2.f32 %v4329_v8  ;;  %v4330_v61 = vmul.f32 -1.442695, %v6607_v9 }
 0x290   : > { %v5757_v22 = vpop.eup %5756  ;;  %v1996_v23 = vrot.slane %v1995_v12, 4  ;;  %v2102_v48 = vsel %vm6600_vm14, %v1995_v12, %v2101_v7  ;;  %v2004_v24 = vor.u32 %v2003_v14, %v2000_v13  ;;  %v1948_v25 = vmul.f32 %v1913_v21, %v1878_v15 }
 0x291   : > { %2103 = vst [vmem:[#allocation2 + $0x4] sm:$0xe] %v2102_v48  ;;  %v4557_v63 = vpack.c.bf16 %v1947_v18, %v1947_v18  ;;  %v1851_v26 = vadd.f32 1.0, %v5757_v22  ;;  %5766 = vpow2.f32 %v4330_v61  ;;  %v1928_v61 = vpop.permute.xlu0 %1927 }
 0x292   : > { %v5759_v27 = vpop.eup %5758  ;;  %v2005_v5 = vsel %vm6612_vm15, %v1996_v23, %v2004_v24  ;;  %v4558_v29 = vpack.c.bf16 %v1948_v25, %v1948_v25  ;;  %v2006_v51 = vrot.slane %v2004_v24, 4 }
 0x293   : > { %v5761_v10 = vpop.eup %5760  ;;  %2104 = vst.msk [vmem:[#allocation2 + $0x8] sm:$0xf] %vm389_vm8, %v2005_v5  ;;  %v2008_v30 = vshrl.u32 %v4557_v63, 16  ;;  %v2011_v31 = vshll.u32 %v4557_v63, 16  ;;  %5768 = vrcp.f32 %v1851_v26  ;;  %v1852_v32 = vadd.f32 1.0, %v5759_v27 }
 0x294   : > { %v2018_v28 = vshrl.u32 %v4558_v29, 16  ;;  %v2021_v34 = vshll.u32 %v4558_v29, 16  ;;  %v1879_v38 = vmul.f32 %v5761_v10, %v6571_v11 }
 0x295   : > { %v5763_v40 = vpop.eup %5762  ;;  %v2010_v35 = vrot.slane %v2008_v30, 6  ;;  %v2013_v41 = vrot.slane %v2011_v31, 7  ;;  %5770 = vrcp.f32 %v1852_v32 }
 0x296   : > { %v2020_v43 = vrot.slane %v2018_v28, 6  ;;  %v2023_v45 = vrot.slane %v2021_v34, 7  ;;  %v1949_v47 = vmul.f32 %v1918_v42, %v1879_v38  ;;  %v1880_v49 = vmul.f32 %v5763_v40, %v6576_v16  ;;  %v5669_v38 = vld [vmem:[%s7217_s5] sm:$0xff]  }
 0x297   : > { %v2014_v52 = vor.u32 %v2013_v41, %v2010_v35 }
 0x298   : > { %v2024_v3 = vor.u32 %v2023_v45, %v2020_v43  ;;  %v4559_v54 = vpack.c.bf16 %v1949_v47, %v1949_v47  ;;  %v1950_v56 = vmul.f32 %v1923_v53, %v1880_v49  ;;  %v6624_v57 = vld [vmem:[#allocation2 + $0x4] sm:$0xf]  ;;  %v1938_v53 = vpop.permute.xlu0 %1937 }
 0x299   : > { %v5765_v11 = vpop.eup %5764  ;;  %v2015_v55 = vsel %vm6612_vm15, %v2006_v51, %v2014_v52  ;;  %v2016_v58 = vrot.slane %v2014_v52, 4  ;;  %v6629_v59 = vcombine.low %v2119_v50, %v6624_v57 }
 0x29a   : > { %2105 = vst.msk [vmem:[#allocation2 + $0xc] sm:$0xf] %vm389_vm8, %v2015_v55  ;;  %v2028_v16 = vshrl.u32 %v4559_v54, 16  ;;  %v2031_v60 = vshll.u32 %v4559_v54, 16  ;;  %v4560_v20 = vpack.c.bf16 %v1950_v56, %v1950_v56  ;;  %v1853_v39 = vadd.f32 1.0, %v5765_v11  ;;  %v5671_v56 = vld [vmem:[%s7217_s5 + $0x8] sm:$0xff]  }
 0x29b   : > { %v5767_v33 = vpop.eup %5766  ;;  %v2025_v37 = vsel %vm6612_vm15, %v2016_v58, %v2024_v3  ;;  %v2026_v46 = vrot.slane %v2024_v3, 4  ;;  %v2175_v12 = vshll.u32 %v6629_v59, 16  ;;  %v2173_v10 = vshrl.u32 %v6629_v59, 16 }
 0x29c   : > { %2106 = vst.msk [vmem:[#allocation2 + $0x10] sm:$0xf] %vm389_vm8, %v2025_v37  ;;  %v2030_v44 = vrot.slane %v2028_v16, 6  ;;  %v2033_v1 = vrot.slane %v2031_v60, 7  ;;  %v2038_v2 = vshrl.u32 %v4560_v20, 16  ;;  %v2041_v4 = vshll.u32 %v4560_v20, 16 }
 0x29d   : > { %v5769_v7 = vpop.eup %5768  ;;  %5772 = vrcp.f32 %v1853_v39  ;;  %v1854_v8 = vadd.f32 1.0, %v5767_v33  ;;  %v2177_v26 = vrot.slane %v2175_v12, 1 }
 0x29e   : > { %v2034_v13 = vor.u32 %v2033_v1, %v2030_v44  ;;  %v2040_v14 = vrot.slane %v2038_v2, 6  ;;  %v2043_v15 = vrot.slane %v2041_v4, 7  ;;  %v1881_v18 = vmul.f32 %v5769_v7, %v6583_v19  ;;  %v1933_v19 = vpop.permute.xlu1 %1932 }
 0x29f   : > { %v5771_v21 = vpop.eup %5770  ;;  %5774 = vrcp.f32 %v1854_v8 }
 0x2a0   : > { %v2035_v22 = vsel %vm6612_vm15, %v2026_v46, %v2034_v13  ;;  %v2036_v23 = vrot.slane %v2034_v13, 4  ;;  %v2044_v48 = vor.u32 %v2043_v15, %v2040_v14  ;;  %v1951_v24 = vmul.f32 %v1928_v61, %v1881_v18  ;;  %v5675_v18 = vld [vmem:[%s7217_s5 + $0x18] sm:$0xff]  }
 0x2a1   : > { %2107 = vst.msk [vmem:[#allocation2 + $0x14] sm:$0xf] %vm389_vm8, %v2035_v22  ;;  %v1882_v25 = vmul.f32 %v5771_v21, %v6588_v36  ;;  %v6641_v63 = vld [vmem:[#allocation2 + $0x8] sm:$0xff]   ;;  %v2178_v36 = vor.u32 %v2177_v26, %v2173_v10 }
 0x2a2   : > { %v2045_v27 = vsel %vm6612_vm15, %v2036_v23, %v2044_v48  ;;  %v4561_v5 = vpack.c.bf16 %v1951_v24, %v1951_v24  ;;  %v2180_v30 = vshll.u32 %v6641_v63, 16  ;;  %v2046_v47 = vrot.slane %v2044_v48, 4  ;;  %v1943_v60 = vpop.permute.xlu1 %1942 }
 0x2a3   : > { %2108 = vst.msk [vmem:[#allocation2 + $0x18] sm:$0xf] %vm389_vm8, %v2045_v27  ;;  %v1952_v29 = vmul.f32 %v1933_v19, %v1882_v25  ;;  %v2184_v20 = vshrl.u32 %v6641_v63, 16  ;;  %v2116_v25 = vld [vmem:[#allocation2 + $0x2c] sm:$0x1] }
 0x2a4   : > { %v2048_v31 = vshrl.u32 %v4561_v5, 16  ;;  %v2051_v32 = vshll.u32 %v4561_v5, 16  ;;  %v2182_v34 = vrot.slane %v2180_v30, 1 }
 0x2a5   : > { %v4562_v28 = vpack.c.bf16 %v1952_v29, %v1952_v29 }
 0x2a6   : > { %v2050_v40 = vrot.slane %v2048_v31, 6  ;;  %v2053_v35 = vrot.slane %v2051_v32, 7  ;;  %v2183_v45 = vsel %vm449_vm2, %v2178_v36, %v2182_v34  ;;  %v2186_v1 = vor.u32 %v2184_v20, %v2182_v34 }
 0x2a7   : > { %v5773_v41 = vpop.eup %5772  ;;  %v2058_v42 = vshrl.u32 %v4562_v28, 16  ;;  %v2061_v43 = vshll.u32 %v4562_v28, 16  ;;  %4956 = vmatmul.mubr.msk.bf16.vlgmr.msra.gmra.mrb[8].mxu1 %vm2235_vm1, %v2183_v45 }
 0x2a8   : > { %v2054_v49 = vor.u32 %v2053_v35, %v2050_v40  ;;  %v1883_v50 = vmul.f32 %v5773_v41, %v6596_v62  ;;  %v6654_v51 = vld [vmem:[#allocation2 + $0x10] sm:$0xff]   ;;  %4976 = vmatpush3.bf16.msra.mxu1 %v5669_v38  ;;  %4959 = vmatprep.mubr.msk.bf16.mxu1 %vm5949_vm0, %v5948_v0 }
 0x2a9   : > { %v5775_v52 = vpop.eup %5774  ;;  %v2060_v3 = vrot.slane %v2058_v42, 6  ;;  %v2063_v54 = vrot.slane %v2061_v43, 7  ;;  %4977 = vmatprep.subr.bf16.mxu1 %v5948_v0  ;;  %v2188_v33 = vshll.u32 %v6654_v51, 16  ;;  %v2192_v29 = vshrl.u32 %v6654_v51, 16 }
 0x2aa   : > { %v2055_v11 = vsel %vm6612_vm15, %v2046_v47, %v2054_v49  ;;  %v2056_v62 = vrot.slane %v2054_v49, 4  ;;  %v1953_v55 = vmul.f32 %v1938_v53, %v1883_v50  ;;  %v1884_v58 = vmul.f32 %v5775_v52, %v6607_v9  ;;  %v5673_v9 = vld [vmem:[%s7217_s5 + $0x10] sm:$0xff]   ;;  %v5676_v50 = vld [vmem:[%s7217_s5 + $0x40] sm:$0xff]   ;;  %v5677_v52 = vld [vmem:[%s7217_s5 + $0x48] sm:$0xff]  }
 0x2ab   : > { %2109 = vst.msk [vmem:[#allocation2 + $0x1c] sm:$0xf] %vm389_vm8, %v2055_v11  ;;  %v2064_v16 = vor.u32 %v2063_v54, %v2060_v3  ;;  %v2190_v2 = vrot.slane %v2188_v33, 1  ;;  %v5678_v53 = vld [vmem:[%s7217_s5 + $0x50] sm:$0xff]   ;;  %v5685_v33 = vld [vmem:[%s7217_s5 + $0x78] sm:$0xff]  }
 0x2ac   : > { %v4563_v37 = vpack.c.bf16 %v1953_v55, %v1953_v55  ;;  %v1954_v39 = vmul.f32 %v1943_v60, %v1884_v58  ;;  %4978 = vmatpush3.bf16.msra.mxu1 %v5671_v56  ;;  %v2435_v56 = vld [vmem:[#allocation2] sm:$0xe]  ;;  %v5683_v60 = vld [vmem:[%s7217_s5 + $0x68] sm:$0xff]  }
 0x2ad   : > { %v2065_v44 = vsel %vm6612_vm15, %v2056_v62, %v2064_v16  ;;  %4979 = vmatprep.subr.bf16.mxu1 %v5948_v0  ;;  %v2191_v8 = vsel %vm449_vm2, %v2186_v1, %v2190_v2  ;;  %v2066_v21 = vrot.slane %v2064_v16, 4  ;;  %v2194_v32 = vor.u32 %v2192_v29, %v2190_v2  ;;  %v5682_v58 = vld [vmem:[%s7217_s5 + $0x60] sm:$0xff]   ;;  %v5687_v1 = vld [vmem:[#allocation2 + $0xc] sm:$0xff]  }
 0x2ae   : > { %2110 = vst.msk [vmem:[#allocation2 + $0x20] sm:$0xf] %vm389_vm8, %v2065_v44  ;;  %v2068_v4 = vshrl.u32 %v4563_v37, 16  ;;  %v2071_v7 = vshll.u32 %v4563_v37, 16  ;;  %v4564_v46 = vpack.c.bf16 %v1954_v39, %v1954_v39  ;;  %v4381_v11 = vcombine.low %v2435_v56, %v6624_v57  ;;  %v5686_v2 = vld [vmem:[#allocation2 + $0x4] sm:$0xfe]  }
 0x2af   : > { %4960 = vmatmul.mubr.msk.bf16.gmra.mrb[12].mxu1 %vm2235_vm1, %v2191_v8  ;;  %v2449_v62 = vrot.slane %v6641_v63, 1  ;;  %v2451_v57 = vrot.slane %v6654_v51, 1  ;;  %v5689_v8 = vld [vmem:[#allocation2 + $0x14] sm:$0xff]  }
 0x2b0   : > { %v2070_v12 = vrot.slane %v2068_v4, 6  ;;  %v2073_v13 = vrot.slane %v2071_v7, 7  ;;  %v2078_v14 = vshrl.u32 %v4564_v46, 16  ;;  %v2081_v15 = vshll.u32 %v4564_v46, 16  ;;  %4963 = vmatprep.mubr.msk.bf16.mxu1 %vm5949_vm0, %v5948_v0  ;;  %4980 = vmatpush3.bf16.msra.mxu1 %v5673_v9  ;;  %v5688_v7 = vld [vmem:[%s7217_s5 + $0x80] sm:$0xff]  }
 0x2b1   : > { %4981 = vmatprep.subr.bf16.mxu1 %v5948_v0  ;;  %v2448_v55 = vrot.slane %v4381_v11, 1  ;;  %v2452_v20 = vsel %vm698_vm3, %v2449_v62, %v2451_v57  ;;  %v2624_v9 = vrot.slane %v5687_v1, 1  ;;  %v2623_v4 = vrot.slane %v5686_v2, 1 }
 0x2b2   : > { %v2074_v61 = vor.u32 %v2073_v13, %v2070_v12  ;;  %v2080_v22 = vrot.slane %v2078_v14, 6  ;;  %v2083_v23 = vrot.slane %v2081_v15, 7  ;;  %v6687_v24 = vld [vmem:[#allocation2 + $0x18] sm:$0xff]   ;;  %v5690_v12 = vld [vmem:[%s7217_s5 + $0x88] sm:$0xff]   ;;  %v2626_v13 = vrot.slane %v5689_v8, 1  ;;  %v5692_v14 = vld [vmem:[%s7217_s5 + $0x90] sm:$0xff]  }
 0x2b3   : > { %v2196_v10 = vshll.u32 %v6687_v24, 16  ;;  %v2200_v35 = vshrl.u32 %v6687_v24, 16  ;;  %v2450_v16 = vsel %vm698_vm3, %v2448_v55, %v2449_v62  ;;  %v2625_v46 = vsel %vm698_vm3, %v2623_v4, %v2624_v9  ;;  %v5706_v8 = vld [vmem:[%s7217_s5 + $0xc0] sm:$0xff]  }
 0x2b4   : > { %v2075_v26 = vsel %vm6612_vm15, %v2066_v21, %v2074_v61  ;;  %v2076_v27 = vrot.slane %v2074_v61, 4  ;;  %v2084_v19 = vor.u32 %v2083_v23, %v2080_v22  ;;  %v2086_v5 = vrot.slane %v2080_v22, 4  ;;  %4982 = vmatpush3.bf16.msra.mxu1 %v5675_v18  ;;  %v5694_v21 = vld [vmem:[%s7217_s5 + $0x98] sm:$0xff]  }
 0x2b5   : > { %2111 = vst.msk [vmem:[#allocation2 + $0x24] sm:$0xf] %vm389_vm8, %v2075_v26  ;;  %5003 = vmatprep.subr.bf16.mxu1 %v5948_v0  ;;  %v2198_v28 = vrot.slane %v2196_v10, 1  ;;  %v2127_v34 = vld [vmem:[#allocation2 + $0x20] sm:$0xf]  ;;  %v2627_v15 = vsel %vm698_vm3, %v2624_v9, %v2626_v13 }
 0x2b6   : > { %v2085_v30 = vsel %vm6612_vm15, %v2076_v27, %v2084_v19  ;;  %v2117_v31 = vsel %vm6683_vm11, %v2086_v5, %v2116_v25  ;;  %v5691_v18 = vld [vmem:[#allocation2 + $0x1c] sm:$0xff]   ;;  %v6820_v25 = vld [vmem:[#allocation2 + $0x8] sm:$0xf]  ;;  %v6823_v27 = vld [vmem:[#allocation2 + $0xc] sm:$0xff]  }
 0x2b7   : > { %2112 = vst.msk [vmem:[#allocation2 + $0x28] sm:$0xf] %vm389_vm8, %v2085_v30  ;;  %2118 = vst [vmem:[#allocation2 + $0x2c] sm:$0x1] %v2117_v31  ;;  %v2199_v36 = vsel %vm449_vm2, %v2194_v32, %v2198_v28  ;;  %v2202_v42 = vor.u32 %v2200_v35, %v2198_v28  ;;  %v2628_v61 = vrot.slane %v5691_v18, 1  ;;  %v2811_v29 = vshrl.u32 %v6823_v27, 16 }
 0x2b8   : > { %4964 = vmatmul.mubr.msk.bf16.gmra.mrb[16].mxu1 %vm2235_vm1, %v2199_v36  ;;  %v6826_v19 = vld [vmem:[#allocation2 + $0x4] sm:$0xe]  ;;  %v2814_v10 = vshll.u32 %v6823_v27, 16  ;;  %v6834_v36 = vld [vmem:[#allocation2 + $0x14] sm:$0xff]  }
 0x2b9   : > { %4967 = vmatprep.mubr.msk.bf16.mxu1 %vm5949_vm0, %v5948_v0  ;;  %v2629_v22 = vsel %vm698_vm3, %v2626_v13, %v2628_v61  ;;  %v4421_v5 = vcombine.low %v6826_v19, %v6820_v25  ;;  %v2813_v32 = vrot.slane %v2811_v29, 1  ;;  %v2820_v35 = vshrl.u32 %v6834_v36, 16  ;;  %v2973_v9 = vld [vmem:[#allocation2 + $0x4] sm:$0xc]  ;;  %v5707_v13 = vld [vmem:[%s7217_s5 + $0xc8] sm:$0xff]  }
 0x2ba   : > { %v2816_v28 = vrot.slane %v2814_v10, 2  ;;  %v4444_v4 = vcombine.low %v2973_v9, %v6820_v25  ;;  %v3119_v29 = vld [vmem:[#allocation2 + $0x8] sm:$0xc] }
 0x2bb   : > { %v2803_v30 = vshrl.u32 %v4421_v5, 16  ;;  %v2806_v31 = vshll.u32 %v4421_v5, 16  ;;  %v6920_v5 = vld [vmem:[#allocation2 + $0x10] sm:$0xff]  }
 0x2bc   : > { %v2137_v38 = vld [vmem:[#allocation2 + $0x24] sm:$0xf] }
 0x2bd   : > { %v6705_v40 = vcombine.low %v2127_v34, %v2137_v38  ;;  %v2128_v3 = vld [vmem:[#allocation2 + $0x24] sm:$0x7]  ;;  %v2808_v38 = vrot.slane %v2806_v31, 2 }
 0x2be   : > { %v4363_v54 = vcombine.low %v2127_v34, %v2128_v3  ;;  %v5693_v23 = vld [vmem:[#allocation2 + $0x24] sm:$0xff]   ;;  %v2805_v34 = vrot.slane %v2803_v30, 1  ;;  %v3168_v30 = vrot.slane %v6920_v5, 2 }
 0x2bf   : > { %v2204_v41 = vshll.u32 %v6705_v40, 16  ;;  %v2208_v47 = vshrl.u32 %v6705_v40, 16  ;;  %v2455_v39 = vrot.slane %v6705_v40, 1  ;;  %v2817_v40 = vor.u32 %v2816_v28, %v2813_v32  ;;  %v5702_v55 = vld [vmem:[#allocation2 + $0x24] sm:$0xff]  }
 0x2c0   : > { %v5712_v32 = vld [vmem:[%s7217_s5 + $0xe0] sm:$0xff]  }
 0x2c1   : > { %v2206_v43 = vrot.slane %v2204_v41, 1  ;;  %v2823_v41 = vshll.u32 %v6834_v36, 16 }
 0x2c3   : > { %v2207_v45 = vsel %vm449_vm2, %v2202_v42, %v2206_v43  ;;  %v2210_v49 = vor.u32 %v2208_v47, %v2206_v43  ;;  %v2809_v42 = vor.u32 %v2808_v38, %v2805_v34  ;;  %v5697_v43 = vld [vmem:[%s7217_s5 + $0xa0] sm:$0xff]   ;;  %v2822_v47 = vrot.slane %v2820_v35, 1  ;;  %v5714_v34 = vld [vmem:[%s7217_s5 + $0xe8] sm:$0xff]  }
 0x2c4   : > { %4968 = vmatmul.mubr.msk.bf16.gmra.mrb[20].mxu1 %vm2235_vm1, %v2207_v45 }
 0x2c5   : > { %4971 = vmatprep.mubr.msk.bf16.mxu1 %vm5949_vm0, %v5948_v0  ;;  %v2818_v45 = vsel %vm1021_vm4, %v2809_v42, %v2817_v40  ;;  %v5718_v42 = vld [vmem:[%s7217_s5 + $0xf8] sm:$0xff]  }
 0x2cc   : > { %4972 = vmatmul.mubr.msk.bf16.gmra.mrb[24].mxu1 %vm2235_vm1, %v2210_v49  ;;  %v2825_v49 = vrot.slane %v2823_v41, 2  ;;  %v6946_v41 = vld [vmem:[#allocation2 + $0x20] sm:$0xff]  }
 0x2cd   : > { %4983 = vmatprep.mubr.msk.bf16.mxu1 %vm5949_vm0, %v5948_v0  ;;  %v3343_v9 = vshll.u32 %v6946_v41, 16 }
 0x2d4   : > { %4984 = vmatmul.mubr.msk.bf16.vlgmr.msra.gmra.mrb[8].mxu1 %vm2235_vm1, %v6629_v59  ;;  %v5679_v59 = vld [vmem:[%s7217_s5 + $0x58] sm:$0xff]  }
 0x2d5   : > { %5004 = vmatpush3.bf16.msra.mxu1 %v5676_v50  ;;  %4987 = vmatprep.mubr.msk.bf16.mxu1 %vm5949_vm0, %v5948_v0  ;;  %v6845_v50 = vld [vmem:[#allocation2 + $0x1c] sm:$0xff]  }
 0x2d6   : > { %5005 = vmatprep.subr.bf16.mxu1 %v5948_v0  ;;  %v2832_v3 = vshll.u32 %v6845_v50, 16 }
 0x2d8   : > { %v2834_v62 = vrot.slane %v2832_v3, 2  ;;  %v3325_v3 = vshll.u32 %v6920_v5, 16 }
 0x2d9   : > { %5006 = vmatpush3.bf16.msra.mxu1 %v5677_v52  ;;  %v5699_v52 = vld [vmem:[%s7217_s5 + $0xa8] sm:$0xff]  }
 0x2da   : > { %5007 = vmatprep.subr.bf16.mxu1 %v5948_v0 }
 0x2dc   : > { %4988 = vmatmul.mubr.msk.bf16.gmra.mrb[12].mxu1 %vm2235_vm1, %v6641_v63  ;;  %v5684_v63 = vld [vmem:[%s7217_s5 + $0x70] sm:$0xff]  }
 0x2dd   : > { %4991 = vmatprep.mubr.msk.bf16.mxu1 %vm5949_vm0, %v5948_v0  ;;  %5008 = vmatpush3.bf16.msra.mxu1 %v5678_v53  ;;  %v2826_v53 = vor.u32 %v2825_v49, %v2822_v47  ;;  %v6958_v47 = vld [vmem:[#allocation2 + $0x28] sm:$0xff]  }
 0x2de   : > { %5009 = vmatprep.subr.bf16.mxu1 %v5948_v0  ;;  %v3174_v49 = vrot.slane %v6958_v47, 2 }
 0x2df   : > { %v2827_v56 = vsel %vm1021_vm4, %v2817_v40, %v2826_v53  ;;  %v5716_v40 = vld [vmem:[%s7217_s5 + $0xf0] sm:$0xff]  }
 0x2e1   : > { %5010 = vmatpush3.bf16.msra.mxu1 %v5679_v59  ;;  %v2829_v59 = vshrl.u32 %v6845_v50, 16 }
 0x2e2   : > { %5031 = vmatprep.subr.bf16.mxu1 %v5948_v0 }
 0x2e3   : > { %v2831_v11 = vrot.slane %v2829_v59, 1  ;;  %v3322_v59 = vshrl.u32 %v6920_v5, 16 }
 0x2e4   : > { %4992 = vmatmul.mubr.msk.bf16.gmra.mrb[16].mxu1 %vm2235_vm1, %v6654_v51  ;;  %v2453_v51 = vrot.slane %v6687_v24, 1 }
 0x2e5   : > { %4995 = vmatprep.mubr.msk.bf16.mxu1 %vm5949_vm0, %v5948_v0 }
 0x2e6   : > { %v2454_v37 = vsel %vm698_vm3, %v2451_v57, %v2453_v51  ;;  %v2456_v44 = vsel %vm698_vm3, %v2453_v51, %v2455_v39  ;;  %v2841_v57 = vshll.u32 %v5702_v55, 16 }
 0x2ec   : > { %4996 = vmatmul.mubr.msk.bf16.gmra.mrb[20].mxu1 %vm2235_vm1, %v6687_v24  ;;  %v2630_v24 = vrot.slane %v5693_v23, 1  ;;  %v2993_v23 = vrot.slane %v5702_v55, 2 }
 0x2ed   : > { %4999 = vmatprep.mubr.msk.bf16.mxu1 %vm5949_vm0, %v5948_v0 }
 0x2ee   : > { %v2631_v26 = vsel %vm698_vm3, %v2628_v61, %v2630_v24  ;;  %v2991_v61 = vrot.slane %v6845_v50, 2 }
 0x2f4   : > { %5000 = vmatmul.mubr.msk.bf16.gmra.mrb[24].mxu1 %vm2235_vm1, %v4363_v54  ;;  %v5701_v54 = vld [vmem:[%s7217_s5 + $0xb0] sm:$0xff]  }
 0x2f5   : > { %5011 = vmatprep.mubr.msk.bf16.mxu1 %vm5949_vm0, %v5948_v0 }
 0x2fc   : > { %5012 = vmatmul.mubr.msk.bf16.vlgmr.msra.gmra.mrb[8].mxu1 %vm2235_vm1, %v2450_v16  ;;  %v2835_v16 = vor.u32 %v2834_v62, %v2831_v11  ;;  %v3324_v62 = vrot.slane %v3322_v59, 2 }
 0x2fd   : > { %5032 = vmatpush3.bf16.msra.mxu1 %v5682_v58  ;;  %5015 = vmatprep.mubr.msk.bf16.mxu1 %vm5949_vm0, %v5948_v0  ;;  %v5703_v58 = vld [vmem:[%s7217_s5 + $0xb8] sm:$0xff]  }
 0x2fe   : > { %5033 = vmatprep.subr.bf16.mxu1 %v5948_v0 }
 0x301   : > { %5034 = vmatpush3.bf16.msra.mxu1 %v5683_v60  ;;  %v2838_v60 = vshrl.u32 %v5702_v55, 16  ;;  %v3327_v55 = vrot.slane %v3325_v3, 3 }
 0x302   : > { %5035 = vmatprep.subr.bf16.mxu1 %v5948_v0 }
 0x304   : > { %5016 = vmatmul.mubr.msk.bf16.gmra.mrb[12].mxu1 %vm2235_vm1, %v2452_v20  ;;  %v2840_v20 = vrot.slane %v2838_v60, 1  ;;  %v3328_v60 = vor.u32 %v3327_v55, %v3324_v62 }
 0x305   : > { %5019 = vmatprep.mubr.msk.bf16.mxu1 %vm5949_vm0, %v5948_v0  ;;  %5036 = vmatpush3.bf16.msra.mxu1 %v5684_v63  ;;  %v2836_v63 = vsel %vm1021_vm4, %v2826_v53, %v2835_v16 }
 0x306   : > { %5037 = vmatprep.subr.bf16.mxu1 %v5948_v0 }
 0x309   : > { %5038 = vmatpush3.bf16.msra.mxu1 %v5685_v33  ;;  %v2843_v33 = vrot.slane %v2841_v57, 2 }
 0x30a   : > { %5059 = vmatprep.subr.bf16.mxu1 %v5948_v0 }
 0x30b   : > { %v2844_v51 = vor.u32 %v2843_v33, %v2840_v20  ;;  %v5720_v33 = vld [vmem:[%s7217_s5 + $0x100] sm:$0xff]  }
 0x30c   : > { %5020 = vmatmul.mubr.msk.bf16.gmra.mrb[16].mxu1 %vm2235_vm1, %v2454_v37  ;;  %v5704_v37 = vld [vmem:[#allocation2 + $0x2c] ss:$0 sps:$4 sm:$0x11]  }
 0x30d   : > { %5023 = vmatprep.mubr.msk.bf16.mxu1 %vm5949_vm0, %v5948_v0  ;;  %v2995_v25 = vrot.slane %v5704_v37, 2 }
 0x314   : > { %5024 = vmatmul.mubr.msk.bf16.gmra.mrb[20].mxu1 %vm2235_vm1, %v2456_v44  ;;  %v2847_v44 = vshll.u32 %v5704_v37, 16 }
 0x315   : > { %5027 = vmatprep.mubr.msk.bf16.mxu1 %vm5949_vm0, %v5948_v0 }
 0x316   : > { %v2849_v1 = vrot.slane %v2847_v44, 2  ;;  %v5721_v44 = vld [vmem:[%s7217_s5 + $0x108] sm:$0xff]  }
 0x318   : > { %v2850_v2 = vsel %vm1021_vm4, %v2844_v51, %v2849_v1 }
 0x31c   : > { %5028 = vmatmul.mubr.msk.bf16.gmra.mrb[24].mxu1 %vm2235_vm1, %v2455_v39  ;;  %v2845_v39 = vsel %vm1021_vm4, %v2835_v16, %v2844_v51 }
 0x31d   : > { %5039 = vmatprep.mubr.msk.bf16.mxu1 %vm5949_vm0, %v5948_v0 }
 0x324   : > { %5040 = vmatmul.mubr.msk.bf16.vlgmr.msra.gmra.mrb[8].mxu1 %vm2235_vm1, %v2625_v46  ;;  %v2986_v46 = vrot.slane %v4444_v4, 2  ;;  %v5722_v4 = vld [vmem:[%s7217_s5 + $0x110] sm:$0xff]  }
 0x325   : > { %5060 = vmatpush3.bf16.msra.mxu1 %v5688_v7  ;;  %5043 = vmatprep.mubr.msk.bf16.mxu1 %vm5949_vm0, %v5948_v0  ;;  %v2987_v7 = vrot.slane %v6823_v27, 2  ;;  %v2996_v27 = vsel %vm1190_vm5, %v2993_v23, %v2995_v25 }
 0x326   : > { %5061 = vmatprep.subr.bf16.mxu1 %v5948_v0 }
 0x329   : > { %5062 = vmatpush3.bf16.msra.mxu1 %v5690_v12  ;;  %v2988_v12 = vsel %vm1190_vm5, %v2986_v46, %v2987_v7 }
 0x32a   : > { %5063 = vmatprep.subr.bf16.mxu1 %v5948_v0 }
 0x32c   : > { %5044 = vmatmul.mubr.msk.bf16.gmra.mrb[12].mxu1 %vm2235_vm1, %v2627_v15  ;;  %v5708_v15 = vld [vmem:[%s7217_s5 + $0xd0] sm:$0xff]  }
 0x32d   : > { %5047 = vmatprep.mubr.msk.bf16.mxu1 %vm5949_vm0, %v5948_v0  ;;  %5064 = vmatpush3.bf16.msra.mxu1 %v5692_v14  ;;  %v2989_v14 = vrot.slane %v6834_v36, 2  ;;  %v6931_v36 = vld [vmem:[#allocation2 + $0x18] sm:$0xff]  }
 0x32e   : > { %5065 = vmatprep.subr.bf16.mxu1 %v5948_v0  ;;  %v3170_v38 = vrot.slane %v6931_v36, 2  ;;  %v3331_v57 = vshrl.u32 %v6931_v36, 16 }
 0x32f   : > { %v2990_v18 = vsel %vm1190_vm5, %v2987_v7, %v2989_v14 }
 0x330   : > { %v3171_v35 = vsel %vm1190_vm5, %v3168_v30, %v3170_v38  ;;  %v3333_v37 = vrot.slane %v3331_v57, 2 }
 0x331   : > { %5066 = vmatpush3.bf16.msra.mxu1 %v5694_v21  ;;  %v5709_v21 = vld [vmem:[%s7217_s5 + $0xd8] sm:$0xff]  }
 0x332   : > { %5087 = vmatprep.subr.bf16.mxu1 %v5948_v0 }
 0x334   : > { %5048 = vmatmul.mubr.msk.bf16.gmra.mrb[16].mxu1 %vm2235_vm1, %v2629_v22  ;;  %v2992_v22 = vsel %vm1190_vm5, %v2989_v14, %v2991_v61  ;;  %v3349_v14 = vshrl.u32 %v6958_v47, 16 }
 0x335   : > { %5051 = vmatprep.mubr.msk.bf16.mxu1 %vm5949_vm0, %v5948_v0 }
 0x33c   : > { %5052 = vmatmul.mubr.msk.bf16.gmra.mrb[20].mxu1 %vm2235_vm1, %v2631_v26  ;;  %v6917_v26 = vld [vmem:[#allocation2 + $0xc] sm:$0xf] }
 0x33d   : > { %5055 = vmatprep.mubr.msk.bf16.mxu1 %vm5949_vm0, %v5948_v0  ;;  %v4462_v10 = vcombine.low %v3119_v29, %v6917_v26 }
 0x33f   : > { %v3167_v31 = vrot.slane %v4462_v10, 2 }
 0x341   : > { %v3169_v28 = vsel %vm1190_vm5, %v3167_v31, %v3168_v30 }
 0x344   : > { %5056 = vmatmul.mubr.msk.bf16.gmra.mrb[24].mxu1 %vm2235_vm1, %v2630_v24  ;;  %v2994_v24 = vsel %vm1190_vm5, %v2991_v61, %v2993_v23 }
 0x345   : > { %5067 = vmatprep.mubr.msk.bf16.mxu1 %vm5949_vm0, %v5948_v0 }
 0x34c   : > { %5068 = vmatmul.mubr.msk.bf16.vlgmr.msra.gmra.mrb[8].mxu1 %vm2235_vm1, %v2818_v45 }
 0x34d   : > { %5088 = vmatpush3.bf16.msra.mxu1 %v5697_v43  ;;  %5071 = vmatprep.mubr.msk.bf16.mxu1 %vm5949_vm0, %v5948_v0  ;;  %v3172_v43 = vrot.slane %v6946_v41, 2 }
 0x34e   : > { %5089 = vmatprep.subr.bf16.mxu1 %v5948_v0 }
 0x34f   : > { %v3173_v45 = vsel %vm1190_vm5, %v3170_v38, %v3172_v43  ;;  %v3175_v50 = vsel %vm1190_vm5, %v3172_v43, %v3174_v49  ;;  %v3508_v43 = vrot.slane %v6958_v47, 3 }
 0x351   : > { %5090 = vmatpush3.bf16.msra.mxu1 %v5699_v52  ;;  %v5719_v52 = vld [vmem:[#allocation2 + $0x30] ss:$0 sps:$4 sm:$0x11]  }
 0x352   : > { %5091 = vmatprep.subr.bf16.mxu1 %v5948_v0  ;;  %v3176_v53 = vrot.slane %v5719_v52, 2  ;;  %v7047_v52 = vld [vmem:[%s7219_s7] ss:$0 sm:$0xff] }
 0x354   : > { %5072 = vmatmul.mubr.msk.bf16.gmra.mrb[12].mxu1 %vm2235_vm1, %v2827_v56  ;;  %v3317_v56 = vshll.u32 %v4462_v10, 16  ;;  %v3177_v11 = vsel %vm1190_vm5, %v3174_v49, %v3176_v53 }
 0x355   : > { %5075 = vmatprep.mubr.msk.bf16.mxu1 %vm5949_vm0, %v5948_v0  ;;  %5092 = vmatpush3.bf16.msra.mxu1 %v5701_v54  ;;  %v3314_v54 = vshrl.u32 %v4462_v10, 16 }
 0x356   : > { %5093 = vmatprep.subr.bf16.mxu1 %v5948_v0  ;;  %v3319_v16 = vrot.slane %v3317_v56, 3 }
 0x359   : > { %5094 = vmatpush3.bf16.msra.mxu1 %v5703_v58  ;;  %v3316_v58 = vrot.slane %v3314_v54, 2 }
 0x35a   : > { %5115 = vmatprep.subr.bf16.mxu1 %v5948_v0 }
 0x35b   : > { %v3320_v20 = vor.u32 %v3319_v16, %v3316_v58 }
 0x35c   : > { %5076 = vmatmul.mubr.msk.bf16.gmra.mrb[16].mxu1 %vm2235_vm1, %v2836_v63  ;;  %v3334_v63 = vshll.u32 %v6931_v36, 16 }
 0x35d   : > { %5079 = vmatprep.mubr.msk.bf16.mxu1 %vm5949_vm0, %v5948_v0  ;;  %v3329_v51 = vsel %vm1486_vm6, %v3320_v20, %v3328_v60 }
 0x364   : > { %5080 = vmatmul.mubr.msk.bf16.gmra.mrb[20].mxu1 %vm2235_vm1, %v2845_v39  ;;  %v3336_v39 = vrot.slane %v3334_v63, 3 }
 0x365   : > { %5083 = vmatprep.mubr.msk.bf16.mxu1 %vm5949_vm0, %v5948_v0 }
 0x366   : > { %v3337_v1 = vor.u32 %v3336_v39, %v3333_v37 }
 0x368   : > { %v3338_v7 = vsel %vm1486_vm6, %v3328_v60, %v3337_v1 }
 0x36c   : > { %5084 = vmatmul.mubr.msk.bf16.gmra.mrb[24].mxu1 %vm2235_vm1, %v2850_v2  ;;  %v3340_v2 = vshrl.u32 %v6946_v41, 16 }
 0x36d   : > { %5095 = vmatprep.mubr.msk.bf16.mxu1 %vm5949_vm0, %v5948_v0 }
 0x36e   : > { %v3342_v46 = vrot.slane %v3340_v2, 2 }
 0x374   : > { %5096 = vmatmul.mubr.msk.bf16.vlgmr.msra.gmra.mrb[8].mxu1 %vm2235_vm1, %v2988_v12  ;;  %v5723_v12 = vld [vmem:[%s7217_s5 + $0x118] sm:$0xff]  }
 0x375   : > { %5116 = vmatpush3.bf16.msra.mxu1 %v5706_v8  ;;  %5099 = vmatprep.mubr.msk.bf16.mxu1 %vm5949_vm0, %v5948_v0  ;;  %v3345_v8 = vrot.slane %v3343_v9, 3 }
 0x376   : > { %5117 = vmatprep.subr.bf16.mxu1 %v5948_v0 }
 0x379   : > { %5118 = vmatpush3.bf16.msra.mxu1 %v5707_v13  ;;  %v3346_v13 = vor.u32 %v3345_v8, %v3342_v46 }
 0x37a   : > { %5119 = vmatprep.subr.bf16.mxu1 %v5948_v0 }
 0x37c   : > { %5100 = vmatmul.mubr.msk.bf16.gmra.mrb[12].mxu1 %vm2235_vm1, %v2990_v18  ;;  %v3347_v18 = vsel %vm1486_vm6, %v3337_v1, %v3346_v13 }
 0x37d   : > { %5103 = vmatprep.mubr.msk.bf16.mxu1 %vm5949_vm0, %v5948_v0  ;;  %5120 = vmatpush3.bf16.msra.mxu1 %v5708_v15  ;;  %v3352_v15 = vshll.u32 %v6958_v47, 16 }
 0x37e   : > { %5121 = vmatprep.subr.bf16.mxu1 %v5948_v0 }
 0x37f   : > { %v3354_v61 = vrot.slane %v3352_v15, 3 }
 0x381   : > { %5122 = vmatpush3.bf16.msra.mxu1 %v5709_v21  ;;  %v3351_v21 = vrot.slane %v3349_v14, 2 }
 0x382   : > { %5143 = vmatprep.subr.bf16.mxu1 %v5948_v0 }
 0x383   : > { %v3355_v23 = vor.u32 %v3354_v61, %v3351_v21 }
 0x384   : > { %5104 = vmatmul.mubr.msk.bf16.gmra.mrb[16].mxu1 %vm2235_vm1, %v2992_v22  ;;  %v5724_v22 = vld [vmem:[#allocation2 + $0x30] ss:$0 sps:$4 sm:$0x33]  }
 0x385   : > { %5107 = vmatprep.mubr.msk.bf16.mxu1 %vm5949_vm0, %v5948_v0  ;;  %v3361_v25 = vshll.u32 %v5724_v22, 16 }
 0x387   : > { %v3363_v10 = vrot.slane %v3361_v25, 3 }
 0x38c   : > { %5108 = vmatmul.mubr.msk.bf16.gmra.mrb[20].mxu1 %vm2235_vm1, %v2994_v24  ;;  %v3358_v24 = vshrl.u32 %v5724_v22, 16 }
 0x38d   : > { %5111 = vmatprep.mubr.msk.bf16.mxu1 %vm5949_vm0, %v5948_v0 }
 0x38e   : > { %v3360_v29 = vrot.slane %v3358_v24, 2 }
 0x390   : > { %v3364_v30 = vor.u32 %v3363_v10, %v3360_v29 }
 0x392   : > { %v3365_v31 = vsel %vm1486_vm6, %v3355_v23, %v3364_v30 }
 0x394   : > { %5112 = vmatmul.mubr.msk.bf16.gmra.mrb[24].mxu1 %vm2235_vm1, %v2996_v27  ;;  %v3356_v27 = vsel %vm1486_vm6, %v3346_v13, %v3355_v23 }
 0x395   : > { %5123 = vmatprep.mubr.msk.bf16.mxu1 %vm5949_vm0, %v5948_v0 }
 0x39c   : > { %5124 = vmatmul.mubr.msk.bf16.vlgmr.msra.gmra.mrb[8].mxu1 %vm2235_vm1, %v3169_v28 }
 0x39d   : > { %5144 = vmatpush3.bf16.msra.mxu1 %v5712_v32  ;;  %5127 = vmatprep.mubr.msk.bf16.mxu1 %vm5949_vm0, %v5948_v0  ;;  %v3488_v32 = vld [vmem:[#allocation2 + $0x8] sm:$0x8] }
 0x39e   : > { %5145 = vmatprep.subr.bf16.mxu1 %v5948_v0  ;;  %v4503_v28 = vcombine.low %v3488_v32, %v6917_v26  ;;  %v3506_v26 = vrot.slane %v6946_v41, 3  ;;  %v5732_v41 = vld [vmem:[#allocation6] sm:$0xff]  }
 0x39f   : > { %5213 = vmatprep.mubr.msk.bf16.mxu0 %vm2235_vm1, %v5732_v41 }
 0x3a0   : > { %v3501_v38 = vrot.slane %v4503_v28, 3 }
 0x3a1   : > { %5146 = vmatpush3.bf16.msra.mxu1 %v5714_v34  ;;  %v3502_v34 = vrot.slane %v6920_v5, 3 }
 0x3a2   : > { %5147 = vmatprep.subr.bf16.mxu1 %v5948_v0 }
 0x3a4   : > { %5128 = vmatmul.mubr.msk.bf16.gmra.mrb[12].mxu1 %vm2235_vm1, %v3171_v35  ;;  %v3504_v35 = vrot.slane %v6931_v36, 3  ;;  %v3509_v36 = vsel %vm1659_vm7, %v3506_v26, %v3508_v43 }
 0x3a5   : > { %5131 = vmatprep.mubr.msk.bf16.mxu1 %vm5949_vm0, %v5948_v0  ;;  %5148 = vmatpush3.bf16.msra.mxu1 %v5716_v40  ;;  %v3503_v40 = vsel %vm1659_vm7, %v3501_v38, %v3502_v34 }
 0x3a6   : > { %5149 = vmatprep.subr.bf16.mxu1 %v5948_v0  ;;  %v3507_v5 = vsel %vm1659_vm7, %v3504_v35, %v3506_v26 }
 0x3a9   : > { %5150 = vmatpush3.bf16.msra.mxu1 %v5718_v42  ;;  %v3505_v42 = vsel %vm1659_vm7, %v3502_v34, %v3504_v35 }
 0x3aa   : > { %5171 = vmatprep.subr.bf16.mxu1 %v5948_v0 }
 0x3ac   : > { %5132 = vmatmul.mubr.msk.bf16.gmra.mrb[16].mxu1 %vm2235_vm1, %v3173_v45  ;;  %v3510_v45 = vrot.slane %v5724_v22, 3 }
 0x3ad   : > { %5135 = vmatprep.mubr.msk.bf16.mxu1 %vm5949_vm0, %v5948_v0 }
 0x3ae   : > { %v3511_v49 = vsel %vm1659_vm7, %v3508_v43, %v3510_v45 }
 0x3b4   : > { %5136 = vmatmul.mubr.msk.bf16.gmra.mrb[20].mxu1 %vm2235_vm1, %v3175_v50  ;;  %v7042_v50 = vld [vmem:[%s7218_s6] ss:$0 sm:$0xff] }
 0x3b5   : > { %5139 = vmatprep.mubr.msk.bf16.mxu1 %vm5949_vm0, %v5948_v0 }
 0x3bc   : > { %5140 = vmatmul.mubr.msk.bf16.gmra.mrb[24].mxu1 %vm2235_vm1, %v3177_v11 }
 0x3bd   : > { %5151 = vmatprep.mubr.msk.bf16.mxu1 %vm5949_vm0, %v5948_v0 }
 0x3c4   : > { %5152 = vmatmul.mubr.msk.bf16.vlgmr.msra.gmra.mrb[8].mxu1 %vm2235_vm1, %v3329_v51 }
 0x3c5   : > { %5172 = vmatpush3.bf16.msra.mxu1 %v5720_v33  ;;  %5155 = vmatprep.mubr.msk.bf16.mxu1 %vm5949_vm0, %v5948_v0 }
 0x3c6   : > { %5173 = vmatprep.subr.bf16.mxu1 %v5948_v0 }
 0x3c9   : > { %5174 = vmatpush3.bf16.msra.mxu1 %v5721_v44 }
 0x3ca   : > { %5175 = vmatprep.subr.bf16.mxu1 %v5948_v0 }
 0x3cc   : > { %5156 = vmatmul.mubr.msk.bf16.gmra.mrb[12].mxu1 %vm2235_vm1, %v3338_v7 }
 0x3cd   : > { %5159 = vmatprep.mubr.msk.bf16.mxu1 %vm5949_vm0, %v5948_v0  ;;  %5176 = vmatpush3.bf16.msra.mxu1 %v5722_v4 }
 0x3ce   : > { %5177 = vmatprep.subr.bf16.mxu1 %v5948_v0 }
 0x3d1   : > { %5178 = vmatpush3.bf16.msra.mxu1 %v5723_v12 }
 0x3d4   : > { %5160 = vmatmul.mubr.msk.bf16.gmra.mrb[16].mxu1 %vm2235_vm1, %v3347_v18 }
 0x3d5   : > { %5163 = vmatprep.mubr.msk.bf16.mxu1 %vm5949_vm0, %v5948_v0 }
 0x3dc   : > { %5164 = vmatmul.mubr.msk.bf16.gmra.mrb[20].mxu1 %vm2235_vm1, %v3356_v27 }
 0x3dd   : > { %5167 = vmatprep.mubr.msk.bf16.mxu1 %vm5949_vm0, %v5948_v0 }
 0x3e4   : > { %5168 = vmatmul.mubr.msk.bf16.gmra.mrb[24].mxu1 %vm2235_vm1, %v3365_v31 }
 0x3e5   : > { %5179 = vmatprep.mubr.msk.bf16.mxu1 %vm5949_vm0, %v5948_v0 }
 0x3ec   : > { %5180 = vmatmul.mubr.msk.bf16.vlgmr.msra.gmra.mrb[8].mxu1 %vm2235_vm1, %v3503_v40 }
 0x3ed   : > { %5183 = vmatprep.mubr.msk.bf16.mxu1 %vm5949_vm0, %v5948_v0 }
 0x3f4   : > { %5184 = vmatmul.mubr.msk.bf16.gmra.mrb[12].mxu1 %vm2235_vm1, %v3505_v42 }
 0x3f5   : > { %5187 = vmatprep.mubr.msk.bf16.mxu1 %vm5949_vm0, %v5948_v0 }
 0x3fc   : > { %5188 = vmatmul.mubr.msk.bf16.gmra.mrb[16].mxu1 %vm2235_vm1, %v3507_v5 }
 0x3fd   : > { %5191 = vmatprep.mubr.msk.bf16.mxu1 %vm5949_vm0, %v5948_v0 }
 0x404   : > { %5192 = vmatmul.mubr.msk.bf16.gmra.mrb[20].mxu1 %vm2235_vm1, %v3509_v36 }
 0x405   : > { %5195 = vmatprep.mubr.msk.bf16.mxu1 %vm5949_vm0, %v5948_v0  ;;  %vm4112_vm0 = vcmask 818176  }
 0x40c   : > { %5196 = vmatmul.mubr.msk.bf16.gmra.mrb[24].mxu1 %vm2235_vm1, %v3511_v49 }
 0x4bf   : > { %v3585_v47 = vpop.f32.mrb[8].mxu1 }
 0x4c0   : > { %v3641_v0 = vmul.f32 %v7042_v50, %v3585_v47  ;;  %v5181_v53 = vpop.f32.mrb[9].mxu1 }
 0x4c1   : > { %v3588_v59 = vpop.f32.mrb[10].mxu1 }
 0x4c2   : > { %v3658_v3 = vadd.f32 %v7047_v52, %v3641_v0  ;;  %v3642_v54 = vmul.f32 %v7042_v50, %v3588_v59  ;;  %v5182_v56 = vpop.f32.mrb[11].mxu1 }
 0x4c4   : > { %v4515_v11 = vmul.f32 -1.442695, %v3658_v3  ;;  %v3659_v62 = vadd.f32 %v7047_v52, %v3642_v54 }
 0x4c6   : > { %5776 = vpow2.f32 %v4515_v11  ;;  %v4516_v55 = vmul.f32 -1.442695, %v3659_v62 }
 0x4c7   : > { %v3593_v58 = vpop.f32.mrb[12].mxu1 }
 0x4c8   : > { %5778 = vpow2.f32 %v4516_v55  ;;  %v3643_v16 = vmul.f32 %v7042_v50, %v3593_v58  ;;  %v5185_v60 = vpop.f32.mrb[13].mxu1 }
 0x4c9   : > { %v3596_v57 = vpop.f32.mrb[14].mxu1 }
 0x4ca   : > { %v7055_v63 = vadd.f32 %v7047_v52, %v3643_v16  ;;  %v3644_v20 = vmul.f32 %v7042_v50, %v3596_v57  ;;  %v5186_v33 = vpop.f32.mrb[15].mxu1 }
 0x4cc   : > { %v4517_v51 = vmul.f32 -1.442695, %v7055_v63  ;;  %v7060_v37 = vadd.f32 %v7047_v52, %v3644_v20 }
 0x4ce   : > { %5780 = vpow2.f32 %v4517_v51  ;;  %v4518_v39 = vmul.f32 -1.442695, %v7060_v37 }
 0x4cf   : > { %v3601_v44 = vpop.f32.mrb[16].mxu1 }
 0x4d0   : > { %v5777_v1 = vpop.eup %5776  ;;  %5782 = vpow2.f32 %v4518_v39  ;;  %v3645_v2 = vmul.f32 %v7042_v50, %v3601_v44  ;;  %v5189_v9 = vpop.f32.mrb[17].mxu1 }
 0x4d1   : > { %v3698_v4 = vadd.f32 1.0, %v5777_v1  ;;  %v3604_v7 = vpop.f32.mrb[18].mxu1 }
 0x4d2   : > { %v5779_v46 = vpop.eup %5778  ;;  %v7065_v8 = vadd.f32 %v7047_v52, %v3645_v2  ;;  %v3646_v12 = vmul.f32 %v7042_v50, %v3604_v7  ;;  %v5190_v13 = vpop.f32.mrb[19].mxu1 }
 0x4d3   : > { %5784 = vrcp.f32 %v3698_v4  ;;  %v3699_v14 = vadd.f32 1.0, %v5779_v46 }
 0x4d4   : > { %v4519_v15 = vmul.f32 -1.442695, %v7065_v8  ;;  %v7070_v18 = vadd.f32 %v7047_v52, %v3646_v12 }
 0x4d5   : > { %5786 = vrcp.f32 %v3699_v14 }
 0x4d6   : > { %5788 = vpow2.f32 %v4519_v15  ;;  %v4520_v21 = vmul.f32 -1.442695, %v7070_v18 }
 0x4d7   : > { %v3609_v61 = vpop.f32.mrb[20].mxu1 }
 0x4d8   : > { %v5781_v22 = vpop.eup %5780  ;;  %5790 = vpow2.f32 %v4520_v21  ;;  %v3647_v23 = vmul.f32 %v7042_v50, %v3609_v61  ;;  %v5193_v24 = vpop.f32.mrb[21].mxu1 }
 0x4d9   : > { %v3700_v25 = vadd.f32 1.0, %v5781_v22  ;;  %v3612_v27 = vpop.f32.mrb[22].mxu1 }
 0x4da   : > { %v5783_v29 = vpop.eup %5782  ;;  %v7075_v10 = vadd.f32 %v7047_v52, %v3647_v23  ;;  %v3648_v30 = vmul.f32 %v7042_v50, %v3612_v27  ;;  %v5194_v31 = vpop.f32.mrb[23].mxu1 }
 0x4db   : > { %5792 = vrcp.f32 %v3700_v25  ;;  %v3701_v32 = vadd.f32 1.0, %v5783_v29 }
 0x4dc   : > { %v4521_v28 = vmul.f32 -1.442695, %v7075_v10  ;;  %v7080_v34 = vadd.f32 %v7047_v52, %v3648_v30 }
 0x4dd   : > { %v5785_v38 = vpop.eup %5784  ;;  %5794 = vrcp.f32 %v3701_v32 }
 0x4de   : > { %v3728_v40 = vmul.f32 %v5785_v38, %v3658_v3  ;;  %5796 = vpow2.f32 %v4521_v28  ;;  %v4522_v35 = vmul.f32 -1.442695, %v7080_v34 }
 0x4df   : > { %v5787_v42 = vpop.eup %5786  ;;  %v3617_v26 = vpop.f32.mrb[24].mxu1 }
 0x4e0   : > { %v5789_v5 = vpop.eup %5788  ;;  %v4565_v43 = vpack.c.bf16 %v3728_v40, %v3728_v40  ;;  %v3729_v36 = vmul.f32 %v5787_v42, %v3659_v62  ;;  %5798 = vpow2.f32 %v4522_v35  ;;  %v3649_v45 = vmul.f32 %v7042_v50, %v3617_v26  ;;  %v5197_v49 = vpop.f32.mrb[25].mxu1 }
 0x4e1   : > { %v3702_v41 = vadd.f32 1.0, %v5789_v5  ;;  %v3620_v47 = vpop.f32.mrb[26].mxu1 }
 0x4e2   : > { %v5791_v0 = vpop.eup %5790  ;;  %v3769_v53 = vshrl.u32 %v4565_v43, 16  ;;  %v3772_v59 = vshll.u32 %v4565_v43, 16  ;;  %v4566_v54 = vpack.c.bf16 %v3729_v36, %v3729_v36  ;;  %v7085_v3 = vadd.f32 %v7047_v52, %v3649_v45  ;;  %v5198_v56 = vpop.f32.mrb[27].mxu1 }
 0x4e3   : > { %5800 = vrcp.f32 %v3702_v41  ;;  %v3703_v11 = vadd.f32 1.0, %v5791_v0  ;;  %v3650_v55 = vmul.f32 %v7042_v50, %v3620_v47 }
 0x4e4   : > { %v3771_v58 = vrot.slane %v3769_v53, 6  ;;  %v3774_v62 = vrot.slane %v3772_v59, 7  ;;  %v3778_v16 = vshrl.u32 %v4566_v54, 16  ;;  %v3781_v60 = vshll.u32 %v4566_v54, 16 }
 0x4e5   : > { %v5793_v57 = vpop.eup %5792  ;;  %5802 = vrcp.f32 %v3703_v11  ;;  %v4523_v20 = vmul.f32 -1.442695, %v7085_v3  ;;  %v7090_v33 = vadd.f32 %v7047_v52, %v3650_v55 }
 0x4e6   : > { %v3775_v51 = vor.u32 %v3774_v62, %v3771_v58  ;;  %v3780_v39 = vrot.slane %v3778_v16, 6  ;;  %v3783_v44 = vrot.slane %v3781_v60, 7  ;;  %v3730_v1 = vmul.f32 %v5793_v57, %v7055_v63 }
 0x4e7   : > { %v5795_v2 = vpop.eup %5794  ;;  %5804 = vpow2.f32 %v4523_v20  ;;  %v4524_v50 = vmul.f32 -1.442695, %v7090_v33 }
 0x4e8   : > { %v5797_v9 = vpop.eup %5796  ;;  %v3776_v4 = vrot.slane %v3775_v51, 4  ;;  %v3878_v7 = vsel %vm6600_vm14, %v3775_v51, %v6826_v19  ;;  %v3784_v46 = vor.u32 %v3783_v44, %v3780_v39  ;;  %v4567_v12 = vpack.c.bf16 %v3730_v1, %v3730_v1 }
 0x4e9   : > { %3879 = vst [vmem:[#allocation2 + $0x4] sm:$0xe] %v3878_v7  ;;  %v3731_v52 = vmul.f32 %v5795_v2, %v7060_v37  ;;  %v3704_v13 = vadd.f32 1.0, %v5797_v9  ;;  %5806 = vpow2.f32 %v4524_v50 }
 0x4ea   : > { %v5799_v14 = vpop.eup %5798  ;;  %v3785_v63 = vsel %vm6612_vm15, %v3776_v4, %v3784_v46  ;;  %v3788_v15 = vshrl.u32 %v4567_v12, 16  ;;  %v3791_v21 = vshll.u32 %v4567_v12, 16  ;;  %v3786_v37 = vrot.slane %v3784_v46, 4 }
 0x4eb   : > { %3880 = vst.msk [vmem:[#allocation2 + $0x8] sm:$0xf] %vm389_vm8, %v3785_v63  ;;  %v4568_v61 = vpack.c.bf16 %v3731_v52, %v3731_v52  ;;  %5808 = vrcp.f32 %v3704_v13  ;;  %v3705_v22 = vadd.f32 1.0, %v5799_v14 }
 0x4ec   : > { %v3790_v6 = vrot.slane %v3788_v15, 6  ;;  %v3793_v19 = vrot.slane %v3791_v21, 7 }
 0x4ed   : > { %v5801_v23 = vpop.eup %5800  ;;  %v3798_v24 = vshrl.u32 %v4568_v61, 16  ;;  %v3801_v25 = vshll.u32 %v4568_v61, 16  ;;  %5810 = vrcp.f32 %v3705_v22 }
 0x4ee   : > { %v3794_v27 = vor.u32 %v3793_v19, %v3790_v6  ;;  %v3732_v29 = vmul.f32 %v5801_v23, %v7065_v8 }
 0x4ef   : > { %v5803_v30 = vpop.eup %5802  ;;  %v3800_v31 = vrot.slane %v3798_v24, 6  ;;  %v3803_v32 = vrot.slane %v3801_v25, 7 }
 0x4f0   : > { %v3795_v28 = vsel %vm6612_vm15, %v3786_v37, %v3794_v27  ;;  %v3796_v38 = vrot.slane %v3794_v27, 4  ;;  %v4569_v40 = vpack.c.bf16 %v3732_v29, %v3732_v29  ;;  %v3733_v35 = vmul.f32 %v5803_v30, %v7070_v18  ;;  %v5725_v42 = vld [vmem:[#allocation2] sm:$0xff]  }
 0x4f1   : > { %v5805_v26 = vpop.eup %5804  ;;  %3881 = vst.msk [vmem:[#allocation2 + $0xc] sm:$0xf] %vm389_vm8, %v3795_v28  ;;  %v3804_v5 = vor.u32 %v3803_v32, %v3800_v31  ;;  %5541 = vmatprep.subr.msk.bf16.mxu0 %vm2235_vm1, %v5725_v42  ;;  %v4027_v47 = vsel %vm2235_vm1, %v5725_v42, 0 }
 0x4f2   : > { %v3808_v43 = vshrl.u32 %v4569_v40, 16  ;;  %v3811_v36 = vshll.u32 %v4569_v40, 16  ;;  %v4570_v45 = vpack.c.bf16 %v3733_v35, %v3733_v35  ;;  %v3706_v49 = vadd.f32 1.0, %v5805_v26  ;;  %5200 = vmatpush3.bf16.xpose.msra.mxu0 %v4027_v47 }
 0x4f3   : > { %v5807_v8 = vpop.eup %5806  ;;  %v3805_v41 = vsel %vm6612_vm15, %v3796_v38, %v3804_v5  ;;  %v3806_v56 = vrot.slane %v3804_v5, 4 }
 0x4f4   : > { %3882 = vst.msk [vmem:[#allocation2 + $0x10] sm:$0xf] %vm389_vm8, %v3805_v41  ;;  %v3810_v18 = vrot.slane %v3808_v43, 6  ;;  %v3813_v0 = vrot.slane %v3811_v36, 7  ;;  %v3818_v53 = vshrl.u32 %v4570_v45, 16  ;;  %v3821_v59 = vshll.u32 %v4570_v45, 16 }
 0x4f5   : > { %v5809_v54 = vpop.eup %5808  ;;  %5812 = vrcp.f32 %v3706_v49  ;;  %v3707_v11 = vadd.f32 1.0, %v5807_v8  ;;  %v3889_v49 = vld [vmem:[#allocation2 + $0x2c] sm:$0x1] }
 0x4f6   : > { %v3814_v55 = vor.u32 %v3813_v0, %v3810_v18  ;;  %v3820_v58 = vrot.slane %v3818_v53, 6  ;;  %v3823_v62 = vrot.slane %v3821_v59, 7  ;;  %v3734_v16 = vmul.f32 %v5809_v54, %v7075_v10  ;;  %v5731_v59 = vld [vmem:[#allocation2 + $0x30] ss:$0 sps:$4 sm:$0x33]  }
 0x4f7   : > { %v5811_v60 = vpop.eup %5810  ;;  %5814 = vrcp.f32 %v3707_v11  ;;  %v4045_v48 = vsel %vm2235_vm1, %v5731_v59, 0  ;;  %v5733_v54 = vld [vmem:[#allocation6 + $0x8] sm:$0xff]   ;;  %v5735_v11 = vld [vmem:[#allocation6 + $0x18] sm:$0xff]  }
 0x4f8   : > { %v3815_v57 = vsel %vm6612_vm15, %v3806_v56, %v3814_v55  ;;  %v3816_v20 = vrot.slane %v3814_v55, 4  ;;  %v3824_v51 = vor.u32 %v3823_v62, %v3820_v58  ;;  %v4571_v39 = vpack.c.bf16 %v3734_v16, %v3734_v16  ;;  %v5726_v44 = vld [vmem:[#allocation2 + $0x8] sm:$0xff]   ;;  %v5734_v56 = vld [vmem:[#allocation6 + $0x10] sm:$0xff]   ;;  %v3924_v55 = vpop.permute.xlu0 %3923  ;;  %v3929_v58 = vpop.permute.xlu1 %3928 }
 0x4f9   : > { %3883 = vst.msk [vmem:[#allocation2 + $0x14] sm:$0xf] %vm389_vm8, %v3815_v57  ;;  %v3735_v1 = vmul.f32 %v5811_v60, %v7080_v34  ;;  %5542 = vmatprep.subr.msk.bf16.mxu0 %vm2235_vm1, %v5726_v44  ;;  %v4030_v4 = vsel %vm2235_vm1, %v5726_v44, 0 }
 0x4fa   : > { %v3825_v2 = vsel %vm6612_vm15, %v3816_v20, %v3824_v51  ;;  %v3828_v50 = vshrl.u32 %v4571_v39, 16  ;;  %v3831_v9 = vshll.u32 %v4571_v39, 16  ;;  %5202 = vmatpush3.bf16.xpose.msra.mxu0 %v4030_v4  ;;  %v3826_v13 = vrot.slane %v3824_v51, 4 }
 0x4fb   : > { %3884 = vst.msk [vmem:[#allocation2 + $0x18] sm:$0xf] %vm389_vm8, %v3825_v2  ;;  %v4572_v10 = vpack.c.bf16 %v3735_v1, %v3735_v1 }
 0x4fc   : > { %v3830_v7 = vrot.slane %v3828_v50, 6  ;;  %v3833_v46 = vrot.slane %v3831_v9, 7  ;;  %v3934_v62 = vpop.permute.xlu0 %3933  ;;  %v3939_v16 = vpop.permute.xlu1 %3938 }
 0x4fd   : > { %v3838_v12 = vshrl.u32 %v4572_v10, 16  ;;  %v3841_v52 = vshll.u32 %v4572_v10, 16 }
 0x4fe   : > { %v3834_v14 = vor.u32 %v3833_v46, %v3830_v7 }
 0x4ff   : > { %v5813_v34 = vpop.eup %5812  ;;  %v3840_v63 = vrot.slane %v3838_v12, 6  ;;  %v3843_v15 = vrot.slane %v3841_v52, 7 }
 0x500   : > { %v3835_v21 = vsel %vm6612_vm15, %v3826_v13, %v3834_v14  ;;  %v3836_v61 = vrot.slane %v3834_v14, 4  ;;  %v3736_v22 = vmul.f32 %v5813_v34, %v7085_v3  ;;  %v5727_v6 = vld [vmem:[#allocation2 + $0x10] sm:$0xff]   ;;  %v3944_v51 = vpop.permute.xlu0 %3943  ;;  %v3949_v50 = vpop.permute.xlu1 %3948 }
 0x501   : > { %v5815_v19 = vpop.eup %5814  ;;  %3885 = vst.msk [vmem:[#allocation2 + $0x1c] sm:$0xf] %vm389_vm8, %v3835_v21  ;;  %v3844_v23 = vor.u32 %v3843_v15, %v3840_v63  ;;  %5543 = vmatprep.subr.msk.bf16.mxu0 %vm2235_vm1, %v5727_v6  ;;  %v4033_v37 = vsel %vm2235_vm1, %v5727_v6, 0 }
 0x502   : > { %v4573_v24 = vpack.c.bf16 %v3736_v22, %v3736_v22  ;;  %v3737_v25 = vmul.f32 %v5815_v19, %v7090_v33  ;;  %5204 = vmatpush3.bf16.xpose.msra.mxu0 %v4033_v37 }
 0x503   : > { %v3845_v27 = vsel %vm6612_vm15, %v3836_v61, %v3844_v23  ;;  %v3846_v40 = vrot.slane %v3844_v23, 4 }
 0x504   : > { %3886 = vst.msk [vmem:[#allocation2 + $0x20] sm:$0xf] %vm389_vm8, %v3845_v27  ;;  %v3848_v29 = vshrl.u32 %v4573_v24, 16  ;;  %v3851_v30 = vshll.u32 %v4573_v24, 16  ;;  %v4574_v3 = vpack.c.bf16 %v3737_v25, %v3737_v25  ;;  %v3954_v10 = vpop.permute.xlu0 %3953  ;;  %v3959_v12 = vpop.permute.xlu1 %3958 }
 0x506   : > { %v3850_v31 = vrot.slane %v3848_v29, 6  ;;  %v3853_v32 = vrot.slane %v3851_v30, 7  ;;  %v3858_v28 = vshrl.u32 %v4574_v3, 16  ;;  %v3861_v38 = vshll.u32 %v4574_v3, 16 }
 0x508   : > { %v3854_v35 = vor.u32 %v3853_v32, %v3850_v31  ;;  %v3860_v33 = vrot.slane %v3858_v28, 6  ;;  %v3863_v42 = vrot.slane %v3861_v38, 7  ;;  %v5728_v26 = vld [vmem:[#allocation2 + $0x18] sm:$0xff]  }
 0x509   : > { %5544 = vmatprep.subr.msk.bf16.mxu0 %vm2235_vm1, %v5728_v26  ;;  %v4036_v8 = vsel %vm2235_vm1, %v5728_v26, 0 }
 0x50a   : > { %v3855_v5 = vsel %vm6612_vm15, %v3846_v40, %v3854_v35  ;;  %v3856_v43 = vrot.slane %v3854_v35, 4  ;;  %v3864_v36 = vor.u32 %v3863_v42, %v3860_v33  ;;  %v3866_v45 = vrot.slane %v3860_v33, 4  ;;  %5206 = vmatpush3.bf16.xpose.msra.mxu0 %v4036_v8 }
 0x50b   : > { %3887 = vst.msk [vmem:[#allocation2 + $0x24] sm:$0xf] %vm389_vm8, %v3855_v5 }
 0x50c   : > { %v3865_v41 = vsel %vm6612_vm15, %v3856_v43, %v3864_v36  ;;  %v3890_v47 = vsel %vm6683_vm11, %v3866_v45, %v3889_v49 }
 0x50d   : > { %3888 = vst.msk [vmem:[#allocation2 + $0x28] sm:$0xf] %vm389_vm8, %v3865_v41  ;;  %3891 = vst [vmem:[#allocation2 + $0x2c] sm:$0x1] %v3890_v47 }
 0x512   : > { %v5729_v18 = vld [vmem:[#allocation2 + $0x20] sm:$0xff]  }
 0x513   : > { %5545 = vmatprep.subr.msk.bf16.mxu0 %vm2235_vm1, %v5729_v18  ;;  %v4039_v0 = vsel %vm2235_vm1, %v5729_v18, 0 }
 0x514   : > { %v5730_v53 = vld [vmem:[#allocation2 + $0x28] sm:$0xff]   ;;  %5208 = vmatpush3.bf16.xpose.msra.mxu0 %v4039_v0 }
 0x515   : > { %5546 = vmatprep.subr.msk.bf16.mxu0 %vm2235_vm1, %v5730_v53  ;;  %v4042_v17 = vsel %vm2235_vm1, %v5730_v53, 0 }
 0x51c   : > { %5210 = vmatpush3.bf16.xpose.msra.mxu0 %v4042_v17 }
 0x51d   : > { %5547 = vmatprep.subr.msk.bf16.mxu0 %vm2235_vm1, %v5731_v59 }
 0x524   : > { %5212 = vmatpush3.bf16.xpose.msra.mxu0 %v4045_v48 }
 0x52b   : > { %5214 = vmatmul.mubr.msk.bf16.vlgmr.msra.gmra.mrb[20].mxu0 %vm2235_vm1, %v5733_v54 }
 0x52c   : > { %5217 = vmatprep.mubr.msk.bf16.mxu0 %vm2235_vm1, %v5734_v56 }
 0x533   : > { %5218 = vmatmul.mubr.msk.bf16.gmra.mrb[24].mxu0 %vm2235_vm1, %v5735_v11 }
 0x5fe   : > { %v5215_v60 = vpop.f32.mrb[20].mxu0 }
 0x5ff   : > { %v4090_v57 = vadd.f32 %v5215_v60, %v3934_v62  ;;  %v4081_v20 = vpop.f32.mrb[21].mxu0 }
 0x600   : > { %v4082_v39 = vadd.f32 %v4081_v20, %v3924_v55  ;;  %v5216_v44 = vpop.f32.mrb[22].mxu0 }
 0x601   : > { %4115 = vst.msk [vmem:[%s382_s12 + $0x10] sm:$0xff] %vm4112_vm0, %v4090_v57  ;;  %v4093_v1 = vadd.f32 %v5216_v44, %v3939_v16  ;;  %v4084_v2 = vpop.f32.mrb[23].mxu0 }
 0x602   : > { %4113 = vst.msk [vmem:[%s382_s12] sm:$0xff] %vm4112_vm0, %v4082_v39  ;;  %v4085_v9 = vadd.f32 %v4084_v2, %v3929_v58 }
 0x603   : > { %4116 = vst.msk [vmem:[%s382_s12 + $0x18] sm:$0xff] %vm4112_vm0, %v4093_v1 }
 0x604   : > { %4114 = vst.msk [vmem:[%s382_s12 + $0x8] sm:$0xff] %vm4112_vm0, %v4085_v9 }
 0x606   : > { %v5219_v4 = vpop.f32.mrb[24].mxu0 }
 0x607   : > { %v4106_v7 = vadd.f32 %v5219_v4, %v3954_v10  ;;  %v4097_v46 = vpop.f32.mrb[25].mxu0 }
 0x608   : > { %v4098_v52 = vadd.f32 %v4097_v46, %v3944_v51  ;;  %v5220_v13 = vpop.f32.mrb[26].mxu0 }
 0x609   : > { %4119 = vst.msk [vmem:[%s382_s12 + $0x30] sm:$0xff] %vm4112_vm0, %v4106_v7  ;;  %v4109_v14 = vadd.f32 %v5220_v13, %v3959_v12  ;;  %v4100_v34 = vpop.f32.mrb[27].mxu0 }
 0x60a   : > { %4117 = vst.msk [vmem:[%s382_s12 + $0x20] sm:$0xff] %vm4112_vm0, %v4098_v52  ;;  %v4101_v63 = vadd.f32 %v4100_v34, %v3949_v50 }
 0x60b   : > { %4120 = vst.msk [vmem:[%s382_s12 + $0x38] sm:$0xff] %vm4112_vm0, %v4109_v14 }
 0x60c   : > { %4118 = vst.msk [vmem:[%s382_s12 + $0x28] sm:$0xff] %vm4112_vm0, %v4101_v63 }
 0x60d   : > { %5885 = shalt.err (!%p5882_p11)
}
 0x60e   : > { %s5886_s19 = scalar_lea.hbm %s7162_s26, 1024  ;;  %s5890_s28 = scalar_lea.hbm %s7222_s10, 2048 }
 0x60f   : > { %p5887_p13 = scmp.ne.s32.totalorder %s7162_s26, %s5886_s19  ;;  %p5891_p6 = scmp.lt.u32.totalorder %s7162_s26, %s7222_s10 }
 0x610   : > { %p5892_p9 = scmp.lt.u32.totalorder %s5890_s28, %s5886_s19  ;;  %p5894_p12 = scmp.lt.u32.totalorder %s5886_s19, %s7162_s26 }
 0x611   : > { %p5888_p5 = pnand %p5887_p13, %p7249_p1 }
 0x612   : > { %p5893_p10 = por %p5892_p9, %p5891_p6 }
 0x613   : > { %p5889_p0 = pneg %p5888_p5 }
 0x614   : > { %p5895_p2 = por %p5894_p12, %p5893_p10 }
 0x616   : > { %p5896_p3 = pnand %p5895_p2, %p5889_p0 }
 0x618   : > { %5899 = shalt.err (!%p5896_p3)
}
 0x619   : > { %s5952_s22 = smov 128   ;;  %s5953_s20 = smov 8  }
 0x61a   : > { %5557 = dma.vmem_to_hbm [thread:$0]  (%p7249_p1), %s7164_s18, 1024, %s7162_s26, %s7171_s17, %s5952_s22, %s5952_s22, %s5953_s20  }
 0x61b PF: > { %s7250_s21 = sld [smem:[#allocation15_spill]]  ;;  %p5574_p4 = scmp.ge.s32.totalorder %s5942_s16, 2 }
 0x61c   : > { %s4150_s29 = sand.u32 1, %s5930_s13  }
 0x61d   : > { %s4151_s27 = scalar_lea.sflag [#allocation5], %s4150_s29 }
 0x621   : > { %p7251_p7 = scmp.ne.s32.totalorder %s7250_s21, 0 }
 0x623   : > { %p5567_p8 = pnand %p5574_p4, %p7251_p7 }
 0x625   : > { %5925 = dma.done.wait (!%p5567_p8), %s4151_s27, 1024  }
 0x626   : > { %5927 = vsyncadd (!%p5567_p8), %s4151_s27, 4294966272  ;;  %s7252_s16 = sld [smem:[#allocation13_spill]]  ;;  %s7253_s11 = sld [smem:[#allocation12_spill]] }
 0x627   : > { %s7254_s15 = sld [smem:[#allocation14_spill]]  ;;  %s7255_s13 = smov %s5934_s14 }
 0x62c   : > { %p22_p11 = scmp.ge.s32.totalorder %s7252_s16, 4   ;;  %s7256_s14 = smov %s7253_s11 }
 0x62e   :  { %24 = sbr.rel (!%p22_p11) target bundleno = 5 (0x5), region = 120 }
 0x635   :  { %4156 = vsyncpa [#allocation4], 1 }
 0x636   :  { %4158 = vsyncpa [#allocation4 + $0x1], 1 }
 0x637   :  { %4159 = vsyncpa [#allocation7], 1 }
 0x638   :  { %4160 = vsyncpa [#allocation5], 1 }
 0x639   :  { %4162 = vsyncpa [#allocation5 + $0x1], 1 }

</bundles_post_ra>
